<compile_context>
chip_gen: v7x
topology: tpu7x:2x2x1
jax: 0.10.0
libtpu: 0.0.40
codegen_flags: <defaults>
</compile_context>

<pallas_src>
import functools
import itertools
import math

import jax
import jax.numpy as jnp
from jax.experimental import pallas as pl
from jax.experimental.pallas import tpu as pltpu

NEG_INF = -1e30
MXU_DTYPE = jnp.bfloat16      # MXU operand dtype; accumulation is always f32.
LANE = 128


# ------------------------------ static helpers ------------------------------

def _round_up(x, m):
    return ((x + m - 1) // m) * m


def _channel_schedule(config):
    """Per-consumer input-channel counts as the dense concat grows."""
    c = config["input_dim"]
    sa_cin, tc_cin = [], []
    n_stacks = len(config["key_dims"])
    for s in range(n_stacks):
        sa_cin.append(c)
        c += config["value_dims"][s]
        layers = []
        if s < n_stacks - 1:
            for _ in range(config["n_layers"]):
                layers.append(c)
                c += config["filter_dims"][s]
        tc_cin.append(tuple(layers))
    return tuple(sa_cin), tuple(tc_cin), c


def _pick_batch_block(B, T, target_rows=512):
    """Largest batch block whose row count (b*T) is 8-aligned and <= target."""
    best = None
    for cand in range(1, B + 1):
        if B % cand == 0 and (cand * T) % 8 == 0 and cand * T <= target_rows:
            best = cand
    return best if best is not None else B


# --------------------------------- kernel -----------------------------------

def _snail_fwd_kernel(*refs, T, b_blk, in_dim, key_dims, value_dims,
                      filter_dims, n_layers):
    """Fully fused SNAIL forward for b_blk batch elements (rows = b_blk*T)."""
    n_stacks = len(key_dims)
    M = b_blk * T

    # Unpack refs in the same order the wrapper passed them.
    it = iter(refs)
    x_ref = next(it)
    stack_refs = []
    for s in range(n_stacks):
        sa_w, sa_b = next(it), next(it)
        tc = []
        if s < n_stacks - 1:
            for _ in range(n_layers):
                tc.append((next(it), next(it)))
        stack_refs.append((sa_w, sa_b, tc))
    ow_ref, ob_ref = next(it), next(it)
    o_ref = next(it)
    act_ref = next(it)
    assert not list(it)

    # Zero the concat scratch once so the 128-aligned prefix reads and the
    # zero-padded weight rows only ever see zeros in not-yet-written columns.
    act_ref[...] = jnp.zeros_like(act_ref)

    def append(piece_f32, col0):
        w = piece_f32.shape[1]
        act_ref[:, col0:col0 + w] = piece_f32.astype(MXU_DTYPE)

    def concat_prefix(c_in):
        # 128-aligned bf16 prefix of the running concat (matches weight rows).
        return act_ref[:, :_round_up(c_in, LANE)]

    append(x_ref[...], 0)
    c = in_dim

    for s in range(n_stacks):
        sa_w_ref, sa_b_ref, tc_refs = stack_refs[s]
        dk, dv = key_dims[s], value_dims[s]

        # ---- causal self-attention (fused Q|K|V projection, one big-K dot) --
        h = concat_prefix(c)                                        # bf16
        qkv = jnp.dot(h, sa_w_ref[...], preferred_element_type=jnp.float32)
        qkv = qkv + sa_b_ref[...]                                   # f32
        q = qkv[:, :dk].reshape(b_blk, T, dk)
        k = qkv[:, dk:2 * dk].reshape(b_blk, T, dk)
        v = qkv[:, 2 * dk:].reshape(b_blk, T, dv)
        scores = jnp.einsum('bqd,bkd->bqk', q.astype(MXU_DTYPE),
                            k.astype(MXU_DTYPE),
                            preferred_element_type=jnp.float32)
        scores = scores * (1.0 / math.sqrt(dk))
        row = jax.lax.broadcasted_iota(jnp.int32, (b_blk, T, T), 1)
        col = jax.lax.broadcasted_iota(jnp.int32, (b_blk, T, T), 2)
        scores = jnp.where(col > row, NEG_INF, scores)              # causal
        m = jnp.max(scores, axis=-1, keepdims=True)
        p = jnp.exp(scores - m)
        p = p * pl.reciprocal(jnp.sum(p, axis=-1, keepdims=True), approx=True)
        attn = jnp.einsum('bqk,bkd->bqd', p.astype(MXU_DTYPE),
                          v.astype(MXU_DTYPE),
                          preferred_element_type=jnp.float32)
        append(attn.reshape(M, dv), c)
        c += dv

        # ---- TC dense stack (fused filter|gate and cur|prev per layer) ------
        if s < n_stacks - 1:
            feat = filter_dims[s]
            for l in range(n_layers):
                wl_ref, bl_ref = tc_refs[l]
                d = 2 ** l                                          # dilation
                h = concat_prefix(c)
                y = jnp.dot(h, wl_ref[...], preferred_element_type=jnp.float32)
                y_cur, y_prev = y[:, :2 * feat], y[:, 2 * feat:]
                if d < T:
                    # rows t -> t-d within each batch element; rows crossing an
                    # element boundary land at t < d and are masked to zero.
                    shifted = pltpu.roll(y_prev, shift=d, axis=0)
                    t_idx = jax.lax.broadcasted_iota(
                        jnp.int32, shifted.shape, 0) % T
                    shifted = jnp.where(t_idx < d, 0.0, shifted)
                else:
                    shifted = jnp.zeros_like(y_prev)
                z = y_cur + shifted + bl_ref[...]
                gated = jnp.tanh(z[:, :feat]) * jax.nn.sigmoid(z[:, feat:])
                append(gated, c)
                c += feat

    # ---- output linear, folded into the same kernel -------------------------
    h = concat_prefix(c)
    out = jnp.dot(h, ow_ref[...], preferred_element_type=jnp.float32)
    o_ref[...] = out + ob_ref[...]


# ------------------------------ forward wrapper ------------------------------

def make_forward(config):
    """Build the jit-able forward; all structural config stays static Python."""
    sa_cin, tc_cin, c_total = _channel_schedule(config)
    c_pad_total = _round_up(c_total, LANE)
    n_stacks = len(config["key_dims"])
    n_layers = config["n_layers"]

    def _prep_w(w, c_in):
        # Zero-pad rows to the 128-aligned prefix width and cast to bf16.
        rows = _round_up(c_in, LANE)
        pad = rows - w.shape[0]
        if pad:
            w = jnp.pad(w, ((0, pad), (0, 0)))
        return w.astype(MXU_DTYPE)

    def forward(params, x):
        B, T, Di = x.shape
        do = config["output_dim"]
        b_blk = _pick_batch_block(B, T)
        rows = b_blk * T

        const = lambda i: (0, 0)
        args = [x.reshape(B * T, Di)]
        in_specs = [pl.BlockSpec((rows, Di), lambda i: (i, 0))]

        def add_param(arr):
            args.append(arr)
            in_specs.append(pl.BlockSpec(arr.shape, const))

        for s in range(n_stacks):
            st = params["stacks"][s]
            add_param(_prep_w(st["sa"]["w"], sa_cin[s]))
            add_param(st["sa"]["b"])
            if s < n_stacks - 1:
                for l in range(n_layers):
                    add_param(_prep_w(st["tc"][l]["w"], tc_cin[s][l]))
                    add_param(st["tc"][l]["b"])
        add_param(_prep_w(params["out"]["w"], c_total))
        add_param(params["out"]["b"])

        kern = functools.partial(
            _snail_fwd_kernel, T=T, b_blk=b_blk, in_dim=config["input_dim"],
            key_dims=config["key_dims"], value_dims=config["value_dims"],
            filter_dims=config["filter_dims"], n_layers=n_layers)

        out = pl.pallas_call(
            kern,
            out_shape=jax.ShapeDtypeStruct((B * T, do), jnp.float32),
            grid=(B // b_blk,),
            in_specs=in_specs,
            out_specs=pl.BlockSpec((rows, do), lambda i: (i, 0)),
            scratch_shapes=[pltpu.VMEM((rows, c_pad_total), MXU_DTYPE)],
            compiler_params=pltpu.CompilerParams(
                dimension_semantics=("parallel",)),
        )(*args)

        out = out.reshape(B, T, do)
        if do == 1:                                   # torch .squeeze(-1)
            out = out[..., 0]
        return out

    return forward


# --------------------------- parameter construction --------------------------

def _uniform(key, shape, bound):
    return jax.random.uniform(key, shape, jnp.float32, -bound, bound)


def init_params(key, input_dim, output_dim, key_dims, value_dims, filter_dims,
                target_length):
    assert len(key_dims) == len(value_dims)
    assert len(key_dims) - 1 == len(filter_dims)
    n_stacks = len(key_dims)
    n_layers = int(math.ceil(math.log(target_length, 2)))
    counter = itertools.count()
    nk = lambda: jax.random.fold_in(key, next(counter))

    c = input_dim
    stacks = []
    for s in range(n_stacks):
        dk, dv = key_dims[s], value_dims[s]
        bound = 1.0 / math.sqrt(c)                      # nn.Linear default init
        sa = {"w": _uniform(nk(), (c, 2 * dk + dv), bound),   # fused Q|K|V
              "b": _uniform(nk(), (1, 2 * dk + dv), bound)}
        c += dv
        tc = []
        if s < n_stacks - 1:
            feat = filter_dims[s]
            for _ in range(n_layers):
                bound = 1.0 / math.sqrt(2 * c)          # Conv1d (k=2) default
                tc.append({"w": _uniform(nk(), (c, 4 * feat), bound),
                           "b": _uniform(nk(), (1, 2 * feat), bound)})
                c += feat
        stacks.append({"sa": sa, "tc": tc})
    bound = 1.0 / math.sqrt(c)
    out = {"w": _uniform(nk(), (c, output_dim), bound),
           "b": _uniform(nk(), (1, output_dim), bound)}
    params = {"stacks": stacks, "out": out}
    config = {"input_dim": input_dim, "output_dim": output_dim,
              "key_dims": tuple(key_dims), "value_dims": tuple(value_dims),
              "filter_dims": tuple(filter_dims), "n_layers": n_layers}
    return params, config


# ------------------------- pure-JAX reference (f32) --------------------------

def reference_forward(params, x, config):
    """Concat/pad-based SNAIL forward in f32, for validation."""
    n_stacks = len(config["key_dims"])
    n_layers = config["n_layers"]
    h = x.astype(jnp.float32)
    T = h.shape[1]
    for s in range(n_stacks):
        st = params["stacks"][s]
        dk = config["key_dims"][s]
        qkv = jnp.einsum("btc,cn->btn", h, st["sa"]["w"]) + st["sa"]["b"]
        q, k, v = qkv[..., :dk], qkv[..., dk:2 * dk], qkv[..., 2 * dk:]
        sc = jnp.einsum("btd,bsd->bts", q, k) / math.sqrt(dk)
        mask = jnp.tril(jnp.ones((T, T), bool))
        sc = jnp.where(mask[None], sc, NEG_INF)
        p = jax.nn.softmax(sc, axis=-1)
        attn = jnp.einsum("bts,bsd->btd", p, v)
        h = jnp.concatenate([h, attn], axis=-1)
        if s < n_stacks - 1:
            feat = config["filter_dims"][s]
            for l in range(n_layers):
                lyr = st["tc"][l]
                d = 2 ** l
                w_cur, w_prev = lyr["w"][:, :2 * feat], lyr["w"][:, 2 * feat:]
                hs = jnp.pad(h, ((0, 0), (d, 0), (0, 0)))[:, :T, :]
                y = (jnp.einsum("btc,cn->btn", h, w_cur)
                     + jnp.einsum("btc,cn->btn", hs, w_prev) + lyr["b"])
                gated = jnp.tanh(y[..., :feat]) * jax.nn.sigmoid(y[..., feat:])
                h = jnp.concatenate([h, gated], axis=-1)
    out = jnp.einsum("btc,cn->btn", h, params["out"]["w"]) + params["out"]["b"]
    if out.shape[-1] == 1:
        out = out[..., 0]
    return out


# ----------------------------------- main ------------------------------------

if __name__ == "__main__":
    key = jax.random.PRNGKey(0)

    # Small SnailEstimator config.
    B, T = 2, 8
    input_dim, output_dim = 4, 1
    key_dims = [8, 8]
    value_dims = [8, 8]
    filter_dims = [16]
    target_length = T              # n_layers = ceil(log2(8)) = 3

    params, config = init_params(key, input_dim, output_dim, key_dims,
                                 value_dims, filter_dims, target_length)
    x = jax.random.normal(jax.random.fold_in(key, 10_000), (B, T, input_dim),
                          jnp.float32)

    fwd = jax.jit(make_forward(config))
    out = jax.block_until_ready(fwd(params, x))
    assert out.shape == (B, T), out.shape
    assert bool(jnp.all(jnp.isfinite(out)))

    # Validate against a plain-JAX f32 reference (the kernel uses bf16 MXU
    # operands + approx softmax reciprocal, hence the loose tolerance).
    ref = reference_forward(params, x, config)
    max_diff = float(jnp.max(jnp.abs(out - ref)))
    assert jnp.allclose(out, ref, atol=5e-2, rtol=5e-2), f"max |diff| = {max_diff}"

    print("KERNEL_OK")
</pallas_src>

<mosaic_0001>
module attributes {stable_mosaic.version = 11 : i64} {
  func.func @_snail_fwd_kernel(%arg0: i32, %arg1: memref<16x4xf32, #tpu.memory_space<vmem>>, %arg2: memref<128x24xbf16, #tpu.memory_space<vmem>>, %arg3: memref<1x24xf32, #tpu.memory_space<vmem>>, %arg4: memref<128x64xbf16, #tpu.memory_space<vmem>>, %arg5: memref<1x32xf32, #tpu.memory_space<vmem>>, %arg6: memref<128x64xbf16, #tpu.memory_space<vmem>>, %arg7: memref<1x32xf32, #tpu.memory_space<vmem>>, %arg8: memref<128x64xbf16, #tpu.memory_space<vmem>>, %arg9: memref<1x32xf32, #tpu.memory_space<vmem>>, %arg10: memref<128x24xbf16, #tpu.memory_space<vmem>>, %arg11: memref<1x24xf32, #tpu.memory_space<vmem>>, %arg12: memref<128x1xbf16, #tpu.memory_space<vmem>>, %arg13: memref<1x1xf32, #tpu.memory_space<vmem>>, %arg14: memref<16x1xf32, #tpu.memory_space<vmem>>, %arg15: memref<16x128xbf16, #tpu.memory_space<vmem>>) attributes {dimension_semantics = [#tpu.dimension_semantics<parallel>], iteration_bounds = array<i64: 1>, scalar_prefetch = 0 : i64, scratch_operands = 1 : i64, tpu.core_type = #tpu.core_type<tc>, window_params = [{transform_indices = @transform_0, window_bounds = array<i64: 16, 4>}, {pipeline_mode = #tpu.pipeline_mode<synchronous>, transform_indices = @transform_1, window_bounds = array<i64: 128, 24>}, {pipeline_mode = #tpu.pipeline_mode<synchronous>, transform_indices = @transform_2, window_bounds = array<i64: 1, 24>}, {pipeline_mode = #tpu.pipeline_mode<synchronous>, transform_indices = @transform_3, window_bounds = array<i64: 128, 64>}, {pipeline_mode = #tpu.pipeline_mode<synchronous>, transform_indices = @transform_4, window_bounds = array<i64: 1, 32>}, {pipeline_mode = #tpu.pipeline_mode<synchronous>, transform_indices = @transform_5, window_bounds = array<i64: 128, 64>}, {pipeline_mode = #tpu.pipeline_mode<synchronous>, transform_indices = @transform_6, window_bounds = array<i64: 1, 32>}, {pipeline_mode = #tpu.pipeline_mode<synchronous>, transform_indices = @transform_7, window_bounds = array<i64: 128, 64>}, {pipeline_mode = #tpu.pipeline_mode<synchronous>, transform_indices = @transform_8, window_bounds = array<i64: 1, 32>}, {pipeline_mode = #tpu.pipeline_mode<synchronous>, transform_indices = @transform_9, window_bounds = array<i64: 128, 24>}, {pipeline_mode = #tpu.pipeline_mode<synchronous>, transform_indices = @transform_10, window_bounds = array<i64: 1, 24>}, {pipeline_mode = #tpu.pipeline_mode<synchronous>, transform_indices = @transform_11, window_bounds = array<i64: 128, 1>}, {pipeline_mode = #tpu.pipeline_mode<synchronous>, transform_indices = @transform_12, window_bounds = array<i64: 1, 1>}, {transform_indices = @transform_13, window_bounds = array<i64: 16, 1>}]} {
    %cst = arith.constant 0.000000e+00 : bf16
    %0 = vector.broadcast %cst : bf16 to vector<16x128xbf16>
    %c0 = arith.constant 0 : index
    %c0_0 = arith.constant 0 : index
    %1 = vector.load %arg15[%c0, %c0_0] : memref<16x128xbf16, #tpu.memory_space<vmem>>, vector<16x128xbf16>
    tpu.vector_store %arg15[%c0, %c0_0], %0 {strides = array<i32>} : memref<16x128xbf16, #tpu.memory_space<vmem>>, vector<16x128xbf16>,
    %c0_1 = arith.constant 0 : index
    %c0_2 = arith.constant 0 : index
    %2 = vector.load %arg1[%c0_1, %c0_2] : memref<16x4xf32, #tpu.memory_space<vmem>>, vector<16x4xf32>
    %3 = arith.truncf %2 : vector<16x4xf32> to vector<16x4xbf16>
    %c0_3 = arith.constant 0 : index
    %c0_4 = arith.constant 0 : index
    %4 = vector.load %arg15[%c0_3, %c0_4] : memref<16x128xbf16, #tpu.memory_space<vmem>>, vector<16x4xbf16>
    tpu.vector_store %arg15[%c0_3, %c0_4], %3 {strides = array<i32>} : memref<16x128xbf16, #tpu.memory_space<vmem>>, vector<16x4xbf16>,
    %c0_5 = arith.constant 0 : index
    %c0_6 = arith.constant 0 : index
    %5 = vector.load %arg15[%c0_5, %c0_6] : memref<16x128xbf16, #tpu.memory_space<vmem>>, vector<16x128xbf16>
    %c0_7 = arith.constant 0 : index
    %c0_8 = arith.constant 0 : index
    %6 = vector.load %arg2[%c0_7, %c0_8] : memref<128x24xbf16, #tpu.memory_space<vmem>>, vector<128x24xbf16>
    %cst_9 = arith.constant dense<0.000000e+00> : vector<16x24xf32>
    %7 = tpu.matmul %5, %6, %cst_9 {dimension_numbers = #tpu.dot_dimension_numbers<[1], [0], [0], [1], [0, 0, 1, 1], [], []>} : vector<16x128xbf16>, vector<128x24xbf16>, vector<16x24xf32> -> vector<16x24xf32>
    %c0_10 = arith.constant 0 : index
    %c0_11 = arith.constant 0 : index
    %8 = vector.load %arg3[%c0_10, %c0_11] : memref<1x24xf32, #tpu.memory_space<vmem>>, vector<1x24xf32>
    %9 = vector.broadcast %8 : vector<1x24xf32> to vector<16x24xf32>
    %10 = arith.addf %7, %9 : vector<16x24xf32>
    %11 = vector.extract_strided_slice %10 {offsets = [0, 0], sizes = [16, 8], strides = [1, 1]} : vector<16x24xf32> to vector<16x8xf32>
    %12 = vector.shape_cast %11 : vector<16x8xf32> to vector<2x8x8xf32>
    %13 = vector.extract_strided_slice %10 {offsets = [0, 8], sizes = [16, 8], strides = [1, 1]} : vector<16x24xf32> to vector<16x8xf32>
    %14 = vector.shape_cast %13 : vector<16x8xf32> to vector<2x8x8xf32>
    %15 = vector.extract_strided_slice %10 {offsets = [0, 16], sizes = [16, 8], strides = [1, 1]} : vector<16x24xf32> to vector<16x8xf32>
    %16 = vector.shape_cast %15 : vector<16x8xf32> to vector<2x8x8xf32>
    %17 = arith.truncf %12 : vector<2x8x8xf32> to vector<2x8x8xbf16>
    %18 = arith.truncf %14 : vector<2x8x8xf32> to vector<2x8x8xbf16>
    "tpu.trace_start"() <{level = 10 : i32, message = "bqd,bkd->bqk"}> : () -> ()
    %cst_12 = arith.constant dense<0.000000e+00> : vector<2x8x8xf32>
    %19 = tpu.matmul %17, %18, %cst_12 {dimension_numbers = #tpu.dot_dimension_numbers<[2], [2], [1], [1], [0, 0, 0, 1, 1, 1], [0], [0]>} : vector<2x8x8xbf16>, vector<2x8x8xbf16>, vector<2x8x8xf32> -> vector<2x8x8xf32>
    "tpu.trace_stop"() : () -> ()
    %cst_13 = arith.constant 0.353553385 : f32
    %20 = vector.broadcast %cst_13 : f32 to vector<2x8x8xf32>
    %21 = arith.mulf %19, %20 : vector<2x8x8xf32>
    %22 = tpu.iota {dimensions = array<i32: 1>} : vector<2x8x8xi32>
    %23 = tpu.iota {dimensions = array<i32: 2>} : vector<2x8x8xi32>
    %24 = arith.cmpi sgt, %23, %22 : vector<2x8x8xi32>
    %cst_14 = arith.constant -1.000000e+30 : f32
    %25 = vector.broadcast %cst_14 : f32 to vector<2x8x8xf32>
    %26 = arith.select %24, %25, %21 : vector<2x8x8xi1>, vector<2x8x8xf32>
    %cst_15 = arith.constant dense<0xFF800000> : vector<2x8xf32>
    %27 = vector.multi_reduction <maximumf>, %26, %cst_15 [2] : vector<2x8x8xf32> to vector<2x8xf32>
    %28 = vector.shape_cast %27 : vector<2x8xf32> to vector<2x8x1xf32>
    %29 = vector.broadcast %28 : vector<2x8x1xf32> to vector<2x8x8xf32>
    %30 = arith.subf %26, %29 : vector<2x8x8xf32>
    %31 = math.exp %30 : vector<2x8x8xf32>
    %cst_16 = arith.constant dense<0.000000e+00> : vector<2x8xf32>
    %32 = vector.multi_reduction <add>, %31, %cst_16 [2] : vector<2x8x8xf32> to vector<2x8xf32>
    %33 = vector.shape_cast %32 : vector<2x8xf32> to vector<2x8x1xf32>
    %34 = tpu.reciprocal %33 {approx = true} : vector<2x8x1xf32> -> vector<2x8x1xf32>
    %35 = vector.broadcast %34 : vector<2x8x1xf32> to vector<2x8x8xf32>
    %36 = arith.mulf %31, %35 : vector<2x8x8xf32>
    %37 = arith.truncf %36 : vector<2x8x8xf32> to vector<2x8x8xbf16>
    %38 = arith.truncf %16 : vector<2x8x8xf32> to vector<2x8x8xbf16>
    "tpu.trace_start"() <{level = 10 : i32, message = "bqk,bkd->bqd"}> : () -> ()
    %cst_17 = arith.constant dense<0.000000e+00> : vector<2x8x8xf32>
    %39 = tpu.matmul %37, %38, %cst_17 {dimension_numbers = #tpu.dot_dimension_numbers<[2], [1], [1], [2], [0, 0, 0, 1, 1, 2], [0], [0]>} : vector<2x8x8xbf16>, vector<2x8x8xbf16>, vector<2x8x8xf32> -> vector<2x8x8xf32>
    "tpu.trace_stop"() : () -> ()
    %40 = vector.shape_cast %39 : vector<2x8x8xf32> to vector<16x8xf32>
    %41 = arith.truncf %40 : vector<16x8xf32> to vector<16x8xbf16>
    %c0_18 = arith.constant 0 : index
    %c4 = arith.constant 4 : index
    %42 = vector.load %arg15[%c0_18, %c4] : memref<16x128xbf16, #tpu.memory_space<vmem>>, vector<16x8xbf16>
    tpu.vector_store %arg15[%c0_18, %c4], %41 {strides = array<i32>} : memref<16x128xbf16, #tpu.memory_space<vmem>>, vector<16x8xbf16>,
    %c0_19 = arith.constant 0 : index
    %c0_20 = arith.constant 0 : index
    %43 = vector.load %arg15[%c0_19, %c0_20] : memref<16x128xbf16, #tpu.memory_space<vmem>>, vector<16x128xbf16>
    %c0_21 = arith.constant 0 : index
    %c0_22 = arith.constant 0 : index
    %44 = vector.load %arg4[%c0_21, %c0_22] : memref<128x64xbf16, #tpu.memory_space<vmem>>, vector<128x64xbf16>
    %cst_23 = arith.constant dense<0.000000e+00> : vector<16x64xf32>
    %45 = tpu.matmul %43, %44, %cst_23 {dimension_numbers = #tpu.dot_dimension_numbers<[1], [0], [0], [1], [0, 0, 1, 1], [], []>} : vector<16x128xbf16>, vector<128x64xbf16>, vector<16x64xf32> -> vector<16x64xf32>
    %46 = vector.extract_strided_slice %45 {offsets = [0, 0], sizes = [16, 32], strides = [1, 1]} : vector<16x64xf32> to vector<16x32xf32>
    %47 = vector.extract_strided_slice %45 {offsets = [0, 32], sizes = [16, 32], strides = [1, 1]} : vector<16x64xf32> to vector<16x32xf32>
    %c1_i32 = arith.constant 1 : i32
    %48 = tpu.dynamic_rotate %47 by %c1_i32 dim 0 : vector<16x32xf32>, i32 -> vector<16x32xf32>
    %49 = tpu.iota {dimensions = array<i32: 0>} : vector<16x32xi32>
    %c8_i32 = arith.constant 8 : i32
    %c0_i32 = arith.constant 0 : i32
    %50 = arith.cmpi eq, %c8_i32, %c0_i32 : i32
    %c1_i32_24 = arith.constant 1 : i32
    %51 = arith.select %50, %c1_i32_24, %c8_i32 : i32
    %52 = vector.broadcast %51 : i32 to vector<16x32xi32>
    %53 = arith.remsi %49, %52 : vector<16x32xi32>
    %c0_i32_25 = arith.constant 0 : i32
    %54 = vector.broadcast %c0_i32_25 : i32 to vector<16x32xi32>
    %55 = arith.cmpi ne, %53, %54 : vector<16x32xi32>
    %c0_i32_26 = arith.constant 0 : i32
    %56 = vector.broadcast %c0_i32_26 : i32 to vector<16x32xi32>
    %57 = arith.cmpi slt, %53, %56 : vector<16x32xi32>
    %c0_i32_27 = arith.constant 0 : i32
    %58 = arith.cmpi slt, %51, %c0_i32_27 : i32
    %59 = vector.broadcast %58 : i1 to vector<16x32xi1>
    %60 = vector.broadcast %59 : vector<16x32xi1> to vector<16x32xi1>
    %61 = arith.xori %57, %60 : vector<16x32xi1>
    %62 = arith.andi %61, %55 : vector<16x32xi1>
    %63 = vector.broadcast %51 : i32 to vector<16x32xi32>
    %64 = arith.addi %53, %63 : vector<16x32xi32>
    %65 = arith.select %62, %64, %53 : vector<16x32xi1>, vector<16x32xi32>
    %c1_i32_28 = arith.constant 1 : i32
    %66 = vector.broadcast %c1_i32_28 : i32 to vector<16x32xi32>
    %67 = arith.cmpi slt, %65, %66 : vector<16x32xi32>
    %cst_29 = arith.constant 0.000000e+00 : f32
    %68 = vector.broadcast %cst_29 : f32 to vector<16x32xf32>
    %69 = arith.select %67, %68, %48 : vector<16x32xi1>, vector<16x32xf32>
    %70 = arith.addf %46, %69 : vector<16x32xf32>
    %c0_30 = arith.constant 0 : index
    %c0_31 = arith.constant 0 : index
    %71 = vector.load %arg5[%c0_30, %c0_31] : memref<1x32xf32, #tpu.memory_space<vmem>>, vector<1x32xf32>
    %72 = vector.broadcast %71 : vector<1x32xf32> to vector<16x32xf32>
    %73 = arith.addf %70, %72 : vector<16x32xf32>
    %74 = vector.extract_strided_slice %73 {offsets = [0, 0], sizes = [16, 16], strides = [1, 1]} : vector<16x32xf32> to vector<16x16xf32>
    %75 = math.tanh %74 : vector<16x16xf32>
    %76 = vector.extract_strided_slice %73 {offsets = [0, 16], sizes = [16, 16], strides = [1, 1]} : vector<16x32xf32> to vector<16x16xf32>
    %77 = arith.negf %76 : vector<16x16xf32>
    %78 = math.exp %77 : vector<16x16xf32>
    %cst_32 = arith.constant 1.000000e+00 : f32
    %79 = vector.broadcast %cst_32 : f32 to vector<16x16xf32>
    %80 = arith.addf %79, %78 : vector<16x16xf32>
    %81 = arith.divf %79, %80 : vector<16x16xf32>
    %82 = arith.mulf %75, %81 : vector<16x16xf32>
    %83 = arith.truncf %82 : vector<16x16xf32> to vector<16x16xbf16>
    %c0_33 = arith.constant 0 : index
    %c12 = arith.constant 12 : index
    %84 = vector.load %arg15[%c0_33, %c12] : memref<16x128xbf16, #tpu.memory_space<vmem>>, vector<16x16xbf16>
    tpu.vector_store %arg15[%c0_33, %c12], %83 {strides = array<i32>} : memref<16x128xbf16, #tpu.memory_space<vmem>>, vector<16x16xbf16>,
    %c0_34 = arith.constant 0 : index
    %c0_35 = arith.constant 0 : index
    %85 = vector.load %arg15[%c0_34, %c0_35] : memref<16x128xbf16, #tpu.memory_space<vmem>>, vector<16x128xbf16>
    %c0_36 = arith.constant 0 : index
    %c0_37 = arith.constant 0 : index
    %86 = vector.load %arg6[%c0_36, %c0_37] : memref<128x64xbf16, #tpu.memory_space<vmem>>, vector<128x64xbf16>
    %cst_38 = arith.constant dense<0.000000e+00> : vector<16x64xf32>
    %87 = tpu.matmul %85, %86, %cst_38 {dimension_numbers = #tpu.dot_dimension_numbers<[1], [0], [0], [1], [0, 0, 1, 1], [], []>} : vector<16x128xbf16>, vector<128x64xbf16>, vector<16x64xf32> -> vector<16x64xf32>
    %88 = vector.extract_strided_slice %87 {offsets = [0, 0], sizes = [16, 32], strides = [1, 1]} : vector<16x64xf32> to vector<16x32xf32>
    %89 = vector.extract_strided_slice %87 {offsets = [0, 32], sizes = [16, 32], strides = [1, 1]} : vector<16x64xf32> to vector<16x32xf32>
    %c2_i32 = arith.constant 2 : i32
    %90 = tpu.dynamic_rotate %89 by %c2_i32 dim 0 : vector<16x32xf32>, i32 -> vector<16x32xf32>
    %91 = tpu.iota {dimensions = array<i32: 0>} : vector<16x32xi32>
    %c8_i32_39 = arith.constant 8 : i32
    %c0_i32_40 = arith.constant 0 : i32
    %92 = arith.cmpi eq, %c8_i32_39, %c0_i32_40 : i32
    %c1_i32_41 = arith.constant 1 : i32
    %93 = arith.select %92, %c1_i32_41, %c8_i32_39 : i32
    %94 = vector.broadcast %93 : i32 to vector<16x32xi32>
    %95 = arith.remsi %91, %94 : vector<16x32xi32>
    %c0_i32_42 = arith.constant 0 : i32
    %96 = vector.broadcast %c0_i32_42 : i32 to vector<16x32xi32>
    %97 = arith.cmpi ne, %95, %96 : vector<16x32xi32>
    %c0_i32_43 = arith.constant 0 : i32
    %98 = vector.broadcast %c0_i32_43 : i32 to vector<16x32xi32>
    %99 = arith.cmpi slt, %95, %98 : vector<16x32xi32>
    %c0_i32_44 = arith.constant 0 : i32
    %100 = arith.cmpi slt, %93, %c0_i32_44 : i32
    %101 = vector.broadcast %100 : i1 to vector<16x32xi1>
    %102 = vector.broadcast %101 : vector<16x32xi1> to vector<16x32xi1>
    %103 = arith.xori %99, %102 : vector<16x32xi1>
    %104 = arith.andi %103, %97 : vector<16x32xi1>
    %105 = vector.broadcast %93 : i32 to vector<16x32xi32>
    %106 = arith.addi %95, %105 : vector<16x32xi32>
    %107 = arith.select %104, %106, %95 : vector<16x32xi1>, vector<16x32xi32>
    %c2_i32_45 = arith.constant 2 : i32
    %108 = vector.broadcast %c2_i32_45 : i32 to vector<16x32xi32>
    %109 = arith.cmpi slt, %107, %108 : vector<16x32xi32>
    %cst_46 = arith.constant 0.000000e+00 : f32
    %110 = vector.broadcast %cst_46 : f32 to vector<16x32xf32>
    %111 = arith.select %109, %110, %90 : vector<16x32xi1>, vector<16x32xf32>
    %112 = arith.addf %88, %111 : vector<16x32xf32>
    %c0_47 = arith.constant 0 : index
    %c0_48 = arith.constant 0 : index
    %113 = vector.load %arg7[%c0_47, %c0_48] : memref<1x32xf32, #tpu.memory_space<vmem>>, vector<1x32xf32>
    %114 = vector.broadcast %113 : vector<1x32xf32> to vector<16x32xf32>
    %115 = arith.addf %112, %114 : vector<16x32xf32>
    %116 = vector.extract_strided_slice %115 {offsets = [0, 0], sizes = [16, 16], strides = [1, 1]} : vector<16x32xf32> to vector<16x16xf32>
    %117 = math.tanh %116 : vector<16x16xf32>
    %118 = vector.extract_strided_slice %115 {offsets = [0, 16], sizes = [16, 16], strides = [1, 1]} : vector<16x32xf32> to vector<16x16xf32>
    %119 = arith.negf %118 : vector<16x16xf32>
    %120 = math.exp %119 : vector<16x16xf32>
    %cst_49 = arith.constant 1.000000e+00 : f32
    %121 = vector.broadcast %cst_49 : f32 to vector<16x16xf32>
    %122 = arith.addf %121, %120 : vector<16x16xf32>
    %123 = arith.divf %121, %122 : vector<16x16xf32>
    %124 = arith.mulf %117, %123 : vector<16x16xf32>
    %125 = arith.truncf %124 : vector<16x16xf32> to vector<16x16xbf16>
    %c0_50 = arith.constant 0 : index
    %c28 = arith.constant 28 : index
    %126 = vector.load %arg15[%c0_50, %c28] : memref<16x128xbf16, #tpu.memory_space<vmem>>, vector<16x16xbf16>
    tpu.vector_store %arg15[%c0_50, %c28], %125 {strides = array<i32>} : memref<16x128xbf16, #tpu.memory_space<vmem>>, vector<16x16xbf16>,
    %c0_51 = arith.constant 0 : index
    %c0_52 = arith.constant 0 : index
    %127 = vector.load %arg15[%c0_51, %c0_52] : memref<16x128xbf16, #tpu.memory_space<vmem>>, vector<16x128xbf16>
    %c0_53 = arith.constant 0 : index
    %c0_54 = arith.constant 0 : index
    %128 = vector.load %arg8[%c0_53, %c0_54] : memref<128x64xbf16, #tpu.memory_space<vmem>>, vector<128x64xbf16>
    %cst_55 = arith.constant dense<0.000000e+00> : vector<16x64xf32>
    %129 = tpu.matmul %127, %128, %cst_55 {dimension_numbers = #tpu.dot_dimension_numbers<[1], [0], [0], [1], [0, 0, 1, 1], [], []>} : vector<16x128xbf16>, vector<128x64xbf16>, vector<16x64xf32> -> vector<16x64xf32>
    %130 = vector.extract_strided_slice %129 {offsets = [0, 0], sizes = [16, 32], strides = [1, 1]} : vector<16x64xf32> to vector<16x32xf32>
    %131 = vector.extract_strided_slice %129 {offsets = [0, 32], sizes = [16, 32], strides = [1, 1]} : vector<16x64xf32> to vector<16x32xf32>
    %c4_i32 = arith.constant 4 : i32
    %132 = tpu.dynamic_rotate %131 by %c4_i32 dim 0 : vector<16x32xf32>, i32 -> vector<16x32xf32>
    %133 = tpu.iota {dimensions = array<i32: 0>} : vector<16x32xi32>
    %c8_i32_56 = arith.constant 8 : i32
    %c0_i32_57 = arith.constant 0 : i32
    %134 = arith.cmpi eq, %c8_i32_56, %c0_i32_57 : i32
    %c1_i32_58 = arith.constant 1 : i32
    %135 = arith.select %134, %c1_i32_58, %c8_i32_56 : i32
    %136 = vector.broadcast %135 : i32 to vector<16x32xi32>
    %137 = arith.remsi %133, %136 : vector<16x32xi32>
    %c0_i32_59 = arith.constant 0 : i32
    %138 = vector.broadcast %c0_i32_59 : i32 to vector<16x32xi32>
    %139 = arith.cmpi ne, %137, %138 : vector<16x32xi32>
    %c0_i32_60 = arith.constant 0 : i32
    %140 = vector.broadcast %c0_i32_60 : i32 to vector<16x32xi32>
    %141 = arith.cmpi slt, %137, %140 : vector<16x32xi32>
    %c0_i32_61 = arith.constant 0 : i32
    %142 = arith.cmpi slt, %135, %c0_i32_61 : i32
    %143 = vector.broadcast %142 : i1 to vector<16x32xi1>
    %144 = vector.broadcast %143 : vector<16x32xi1> to vector<16x32xi1>
    %145 = arith.xori %141, %144 : vector<16x32xi1>
    %146 = arith.andi %145, %139 : vector<16x32xi1>
    %147 = vector.broadcast %135 : i32 to vector<16x32xi32>
    %148 = arith.addi %137, %147 : vector<16x32xi32>
    %149 = arith.select %146, %148, %137 : vector<16x32xi1>, vector<16x32xi32>
    %c4_i32_62 = arith.constant 4 : i32
    %150 = vector.broadcast %c4_i32_62 : i32 to vector<16x32xi32>
    %151 = arith.cmpi slt, %149, %150 : vector<16x32xi32>
    %cst_63 = arith.constant 0.000000e+00 : f32
    %152 = vector.broadcast %cst_63 : f32 to vector<16x32xf32>
    %153 = arith.select %151, %152, %132 : vector<16x32xi1>, vector<16x32xf32>
    %154 = arith.addf %130, %153 : vector<16x32xf32>
    %c0_64 = arith.constant 0 : index
    %c0_65 = arith.constant 0 : index
    %155 = vector.load %arg9[%c0_64, %c0_65] : memref<1x32xf32, #tpu.memory_space<vmem>>, vector<1x32xf32>
    %156 = vector.broadcast %155 : vector<1x32xf32> to vector<16x32xf32>
    %157 = arith.addf %154, %156 : vector<16x32xf32>
    %158 = vector.extract_strided_slice %157 {offsets = [0, 0], sizes = [16, 16], strides = [1, 1]} : vector<16x32xf32> to vector<16x16xf32>
    %159 = math.tanh %158 : vector<16x16xf32>
    %160 = vector.extract_strided_slice %157 {offsets = [0, 16], sizes = [16, 16], strides = [1, 1]} : vector<16x32xf32> to vector<16x16xf32>
    %161 = arith.negf %160 : vector<16x16xf32>
    %162 = math.exp %161 : vector<16x16xf32>
    %cst_66 = arith.constant 1.000000e+00 : f32
    %163 = vector.broadcast %cst_66 : f32 to vector<16x16xf32>
    %164 = arith.addf %163, %162 : vector<16x16xf32>
    %165 = arith.divf %163, %164 : vector<16x16xf32>
    %166 = arith.mulf %159, %165 : vector<16x16xf32>
    %167 = arith.truncf %166 : vector<16x16xf32> to vector<16x16xbf16>
    %c0_67 = arith.constant 0 : index
    %c44 = arith.constant 44 : index
    %168 = vector.load %arg15[%c0_67, %c44] : memref<16x128xbf16, #tpu.memory_space<vmem>>, vector<16x16xbf16>
    tpu.vector_store %arg15[%c0_67, %c44], %167 {strides = array<i32>} : memref<16x128xbf16, #tpu.memory_space<vmem>>, vector<16x16xbf16>,
    %c0_68 = arith.constant 0 : index
    %c0_69 = arith.constant 0 : index
    %169 = vector.load %arg15[%c0_68, %c0_69] : memref<16x128xbf16, #tpu.memory_space<vmem>>, vector<16x128xbf16>
    %c0_70 = arith.constant 0 : index
    %c0_71 = arith.constant 0 : index
    %170 = vector.load %arg10[%c0_70, %c0_71] : memref<128x24xbf16, #tpu.memory_space<vmem>>, vector<128x24xbf16>
    %cst_72 = arith.constant dense<0.000000e+00> : vector<16x24xf32>
    %171 = tpu.matmul %169, %170, %cst_72 {dimension_numbers = #tpu.dot_dimension_numbers<[1], [0], [0], [1], [0, 0, 1, 1], [], []>} : vector<16x128xbf16>, vector<128x24xbf16>, vector<16x24xf32> -> vector<16x24xf32>
    %c0_73 = arith.constant 0 : index
    %c0_74 = arith.constant 0 : index
    %172 = vector.load %arg11[%c0_73, %c0_74] : memref<1x24xf32, #tpu.memory_space<vmem>>, vector<1x24xf32>
    %173 = vector.broadcast %172 : vector<1x24xf32> to vector<16x24xf32>
    %174 = arith.addf %171, %173 : vector<16x24xf32>
    %175 = vector.extract_strided_slice %174 {offsets = [0, 0], sizes = [16, 8], strides = [1, 1]} : vector<16x24xf32> to vector<16x8xf32>
    %176 = vector.shape_cast %175 : vector<16x8xf32> to vector<2x8x8xf32>
    %177 = vector.extract_strided_slice %174 {offsets = [0, 8], sizes = [16, 8], strides = [1, 1]} : vector<16x24xf32> to vector<16x8xf32>
    %178 = vector.shape_cast %177 : vector<16x8xf32> to vector<2x8x8xf32>
    %179 = vector.extract_strided_slice %174 {offsets = [0, 16], sizes = [16, 8], strides = [1, 1]} : vector<16x24xf32> to vector<16x8xf32>
    %180 = vector.shape_cast %179 : vector<16x8xf32> to vector<2x8x8xf32>
    %181 = arith.truncf %176 : vector<2x8x8xf32> to vector<2x8x8xbf16>
    %182 = arith.truncf %178 : vector<2x8x8xf32> to vector<2x8x8xbf16>
    "tpu.trace_start"() <{level = 10 : i32, message = "bqd,bkd->bqk"}> : () -> ()
    %cst_75 = arith.constant dense<0.000000e+00> : vector<2x8x8xf32>
    %183 = tpu.matmul %181, %182, %cst_75 {dimension_numbers = #tpu.dot_dimension_numbers<[2], [2], [1], [1], [0, 0, 0, 1, 1, 1], [0], [0]>} : vector<2x8x8xbf16>, vector<2x8x8xbf16>, vector<2x8x8xf32> -> vector<2x8x8xf32>
    "tpu.trace_stop"() : () -> ()
    %cst_76 = arith.constant 0.353553385 : f32
    %184 = vector.broadcast %cst_76 : f32 to vector<2x8x8xf32>
    %185 = arith.mulf %183, %184 : vector<2x8x8xf32>
    %186 = tpu.iota {dimensions = array<i32: 1>} : vector<2x8x8xi32>
    %187 = tpu.iota {dimensions = array<i32: 2>} : vector<2x8x8xi32>
    %188 = arith.cmpi sgt, %187, %186 : vector<2x8x8xi32>
    %cst_77 = arith.constant -1.000000e+30 : f32
    %189 = vector.broadcast %cst_77 : f32 to vector<2x8x8xf32>
    %190 = arith.select %188, %189, %185 : vector<2x8x8xi1>, vector<2x8x8xf32>
    %cst_78 = arith.constant dense<0xFF800000> : vector<2x8xf32>
    %191 = vector.multi_reduction <maximumf>, %190, %cst_78 [2] : vector<2x8x8xf32> to vector<2x8xf32>
    %192 = vector.shape_cast %191 : vector<2x8xf32> to vector<2x8x1xf32>
    %193 = vector.broadcast %192 : vector<2x8x1xf32> to vector<2x8x8xf32>
    %194 = arith.subf %190, %193 : vector<2x8x8xf32>
    %195 = math.exp %194 : vector<2x8x8xf32>
    %cst_79 = arith.constant dense<0.000000e+00> : vector<2x8xf32>
    %196 = vector.multi_reduction <add>, %195, %cst_79 [2] : vector<2x8x8xf32> to vector<2x8xf32>
    %197 = vector.shape_cast %196 : vector<2x8xf32> to vector<2x8x1xf32>
    %198 = tpu.reciprocal %197 {approx = true} : vector<2x8x1xf32> -> vector<2x8x1xf32>
    %199 = vector.broadcast %198 : vector<2x8x1xf32> to vector<2x8x8xf32>
    %200 = arith.mulf %195, %199 : vector<2x8x8xf32>
    %201 = arith.truncf %200 : vector<2x8x8xf32> to vector<2x8x8xbf16>
    %202 = arith.truncf %180 : vector<2x8x8xf32> to vector<2x8x8xbf16>
    "tpu.trace_start"() <{level = 10 : i32, message = "bqk,bkd->bqd"}> : () -> ()
    %cst_80 = arith.constant dense<0.000000e+00> : vector<2x8x8xf32>
    %203 = tpu.matmul %201, %202, %cst_80 {dimension_numbers = #tpu.dot_dimension_numbers<[2], [1], [1], [2], [0, 0, 0, 1, 1, 2], [0], [0]>} : vector<2x8x8xbf16>, vector<2x8x8xbf16>, vector<2x8x8xf32> -> vector<2x8x8xf32>
    "tpu.trace_stop"() : () -> ()
    %204 = vector.shape_cast %203 : vector<2x8x8xf32> to vector<16x8xf32>
    %205 = arith.truncf %204 : vector<16x8xf32> to vector<16x8xbf16>
    %c0_81 = arith.constant 0 : index
    %c60 = arith.constant 60 : index
    %206 = vector.load %arg15[%c0_81, %c60] : memref<16x128xbf16, #tpu.memory_space<vmem>>, vector<16x8xbf16>
    tpu.vector_store %arg15[%c0_81, %c60], %205 {strides = array<i32>} : memref<16x128xbf16, #tpu.memory_space<vmem>>, vector<16x8xbf16>,
    %c0_82 = arith.constant 0 : index
    %c0_83 = arith.constant 0 : index
    %207 = vector.load %arg15[%c0_82, %c0_83] : memref<16x128xbf16, #tpu.memory_space<vmem>>, vector<16x128xbf16>
    %c0_84 = arith.constant 0 : index
    %c0_85 = arith.constant 0 : index
    %208 = vector.load %arg12[%c0_84, %c0_85] : memref<128x1xbf16, #tpu.memory_space<vmem>>, vector<128x1xbf16>
    %cst_86 = arith.constant dense<0.000000e+00> : vector<16x1xf32>
    %209 = tpu.matmul %207, %208, %cst_86 {dimension_numbers = #tpu.dot_dimension_numbers<[1], [0], [0], [1], [0, 0, 1, 1], [], []>} : vector<16x128xbf16>, vector<128x1xbf16>, vector<16x1xf32> -> vector<16x1xf32>
    %c0_87 = arith.constant 0 : index
    %c0_88 = arith.constant 0 : index
    %210 = vector.load %arg13[%c0_87, %c0_88] : memref<1x1xf32, #tpu.memory_space<vmem>>, vector<1x1xf32>
    %211 = vector.broadcast %210 : vector<1x1xf32> to vector<16x1xf32>
    %212 = arith.addf %209, %211 : vector<16x1xf32>
    %c0_89 = arith.constant 0 : index
    %c0_90 = arith.constant 0 : index
    %213 = vector.load %arg14[%c0_89, %c0_90] : memref<16x1xf32, #tpu.memory_space<vmem>>, vector<16x1xf32>
    tpu.vector_store %arg14[%c0_89, %c0_90], %212 {strides = array<i32>} : memref<16x1xf32, #tpu.memory_space<vmem>>, vector<16x1xf32>,
    return
  }
  func.func @transform_0(%arg0: i32) -> (i32, i32) {
    %c0_i32 = arith.constant 0 : i32
    %c0_i32_0 = arith.constant 0 : i32
    return %arg0, %c0_i32 : i32, i32
  }
  func.func @transform_1(%arg0: i32) -> (i32, i32) {
    %c0_i32 = arith.constant 0 : i32
    %c0_i32_0 = arith.constant 0 : i32
    %c0_i32_1 = arith.constant 0 : i32
    return %c0_i32, %c0_i32_0 : i32, i32
  }
  func.func @transform_2(%arg0: i32) -> (i32, i32) {
    %c0_i32 = arith.constant 0 : i32
    %c0_i32_0 = arith.constant 0 : i32
    %c0_i32_1 = arith.constant 0 : i32
    return %c0_i32, %c0_i32_0 : i32, i32
  }
  func.func @transform_3(%arg0: i32) -> (i32, i32) {
    %c0_i32 = arith.constant 0 : i32
    %c0_i32_0 = arith.constant 0 : i32
    %c0_i32_1 = arith.constant 0 : i32
    return %c0_i32, %c0_i32_0 : i32, i32
  }
  func.func @transform_4(%arg0: i32) -> (i32, i32) {
    %c0_i32 = arith.constant 0 : i32
    %c0_i32_0 = arith.constant 0 : i32
    %c0_i32_1 = arith.constant 0 : i32
    return %c0_i32, %c0_i32_0 : i32, i32
  }
  func.func @transform_5(%arg0: i32) -> (i32, i32) {
    %c0_i32 = arith.constant 0 : i32
    %c0_i32_0 = arith.constant 0 : i32
    %c0_i32_1 = arith.constant 0 : i32
    return %c0_i32, %c0_i32_0 : i32, i32
  }
  func.func @transform_6(%arg0: i32) -> (i32, i32) {
    %c0_i32 = arith.constant 0 : i32
    %c0_i32_0 = arith.constant 0 : i32
    %c0_i32_1 = arith.constant 0 : i32
    return %c0_i32, %c0_i32_0 : i32, i32
  }
  func.func @transform_7(%arg0: i32) -> (i32, i32) {
    %c0_i32 = arith.constant 0 : i32
    %c0_i32_0 = arith.constant 0 : i32
    %c0_i32_1 = arith.constant 0 : i32
    return %c0_i32, %c0_i32_0 : i32, i32
  }
  func.func @transform_8(%arg0: i32) -> (i32, i32) {
    %c0_i32 = arith.constant 0 : i32
    %c0_i32_0 = arith.constant 0 : i32
    %c0_i32_1 = arith.constant 0 : i32
    return %c0_i32, %c0_i32_0 : i32, i32
  }
  func.func @transform_9(%arg0: i32) -> (i32, i32) {
    %c0_i32 = arith.constant 0 : i32
    %c0_i32_0 = arith.constant 0 : i32
    %c0_i32_1 = arith.constant 0 : i32
    return %c0_i32, %c0_i32_0 : i32, i32
  }
  func.func @transform_10(%arg0: i32) -> (i32, i32) {
    %c0_i32 = arith.constant 0 : i32
    %c0_i32_0 = arith.constant 0 : i32
    %c0_i32_1 = arith.constant 0 : i32
    return %c0_i32, %c0_i32_0 : i32, i32
  }
  func.func @transform_11(%arg0: i32) -> (i32, i32) {
    %c0_i32 = arith.constant 0 : i32
    %c0_i32_0 = arith.constant 0 : i32
    %c0_i32_1 = arith.constant 0 : i32
    return %c0_i32, %c0_i32_0 : i32, i32
  }
  func.func @transform_12(%arg0: i32) -> (i32, i32) {
    %c0_i32 = arith.constant 0 : i32
    %c0_i32_0 = arith.constant 0 : i32
    %c0_i32_1 = arith.constant 0 : i32
    return %c0_i32, %c0_i32_0 : i32, i32
  }
  func.func @transform_13(%arg0: i32) -> (i32, i32) {
    %c0_i32 = arith.constant 0 : i32
    %c0_i32_0 = arith.constant 0 : i32
    return %arg0, %c0_i32 : i32, i32
  }
}

</mosaic_0001>

<bundles_post_ra>
// kernel: forward.1
= control target key start
LH: loop header
LB: loop body
LE: loop exit
PB: predicated region body
PF: predicated region fallthrough
CT: control target
= control target key end

     0   :  { %v1805_v0 = vmov 0.0   ;;  %vm1806_vm0 = vmmov 0   ;;  %v1807_v2 = vmov 0   ;;  %vm51_vm1 = vcmask 31744   ;;  %s1810_s27 = smov 4   ;;  %s1813_s25 = smov 28   ;;  %s2221_s1 = inlined_call_operand.vmem [shape: bf16[128,24], index: 1, kind: input, shape index: {}]   ;;  %s2222_s0 = inlined_call_operand.vmem [shape: f32[16,4], index: 0, kind: input, shape index: {}]   ;;  %s2223_s2 = inlined_call_operand.vmem [shape: f32[1,24], index: 2, kind: input, shape index: {}]   ;;  %s2224_s3 = inlined_call_operand.vmem [shape: bf16[128,64], index: 3, kind: input, shape index: {}]   ;;  %s2225_s4 = inlined_call_operand.vmem [shape: f32[1,32], index: 4, kind: input, shape index: {}]   ;;  %s2226_s5 = inlined_call_operand.vmem [shape: bf16[128,64], index: 5, kind: input, shape index: {}]   ;;  %s2227_s6 = inlined_call_operand.vmem [shape: f32[1,32], index: 6, kind: input, shape index: {}]   ;;  %s2228_s7 = inlined_call_operand.vmem [shape: bf16[128,64], index: 7, kind: input, shape index: {}]   ;;  %s2229_s8 = inlined_call_operand.vmem [shape: f32[1,32], index: 8, kind: input, shape index: {}]   ;;  %s2230_s9 = inlined_call_operand.vmem [shape: bf16[128,24], index: 9, kind: input, shape index: {}]   ;;  %s2231_s10 = inlined_call_operand.vmem [shape: f32[1,24], index: 10, kind: input, shape index: {}]   ;;  %s2232_s11 = inlined_call_operand.vmem [shape: bf16[128,1], index: 11, kind: input, shape index: {}]   ;;  %s2233_s12 = inlined_call_operand.<no memory space> [shape: f32[1,1], index: 12, kind: input, shape index: {}]   ;;  %s2234_s13 = inlined_call_operand.vmem [shape: f32[16,1], index: 13, kind: output, shape index: {}]  }
   0x1   :  { %1526 = vmatprep.subr.bf16.mxu0 %v1805_v0  ;;  %v1705_v1 = vld [vmem:[%s2221_s1] sm:$0xff]   ;;  %1542 = vmatprep.mubr.msk.bf16.mxu0 %vm1806_vm0, %v1805_v0  ;;  %47 = vst [vmem:[#allocation2] sm:$0xff] %v1807_v2  ;;  %v1706_v3 = vld [vmem:[%s2221_s1 + $0x8] sm:$0xff]   ;;  %v1707_v4 = vld [vmem:[%s2221_s1 + $0x10] sm:$0xff]   ;;  %vm171_vm2 = vcmask 64512   ;;  %v269_v27 = vlaneseq  ;;  %vm305_vm4 = vcmask 1043456  }
   0x2   :  { %1546 = vmatprep.subr.bf16.mxu1 %v1805_v0  ;;  %1548 = vmatprep.mubr.msk.bf16.mxu1 %vm1806_vm0, %v1805_v0  ;;  %v48_v5 = vld [vmem:[%s2222_s0] sm:$0xff]  ;;  %v49_v6 = vld [vmem:[%s2222_s0 + $0x8] sm:$0xff]  ;;  %v1708_v8 = vld [vmem:[%s2221_s1 + $0x18] sm:$0xff]   ;;  %vm402_vm5 = vcmask 97312   ;;  %vm592_vm9 = vcmask 228448   ;;  %vm757_vm13 = vcmask 359648  }
   0x3   :  { %1527 = vmatpush3.bf16.msra.mxu0 %v1705_v1  ;;  %v50_v7 = vpack.c.bf16 %v49_v6, %v48_v5  ;;  %v1709_v9 = vld [vmem:[%s2221_s1 + $0x20] sm:$0xff]   ;;  %v1710_v10 = vld [vmem:[%s2221_s1 + $0x28] sm:$0xff]   ;;  %v1711_v11 = vld [vmem:[%s2221_s1 + $0x30] sm:$0xff]   ;;  %v1947_v28 = vshrl.u32 %v269_v27, 7  ;;  %v1949_v29 = vand.u32 127, %v269_v27  ;;  %s1814_s21 = smov 44  }
   0x4   :  { %1528 = vmatprep.subr.bf16.mxu0 %v1805_v0  ;;  %v1712_v12 = vld [vmem:[%s2221_s1 + $0x38] sm:$0xff]   ;;  %v1388_v14 = vld [vmem:[%s2223_s2] ss:$0 sm:$0xff]  ;;  %s1808_s1 = smov 120   ;;  %s1809_s2 = smov 112   ;;  %v1715_v5 = vld [vmem:[%s2224_s3 + $0x10] sm:$0xff]  }
   0x5   :  { %52 = vst.msk [vmem:[#allocation2] sm:$0xff] %vm51_vm1, %v50_v7  ;;  %vm273_vm3 = vcmp.gt.s32.totalorder %v1949_v29, %v1947_v28  ;;  %v1716_v6 = vld [vmem:[%s2224_s3 + $0x18] sm:$0xff]   ;;  %v1717_v7 = vld [vmem:[%s2224_s3 + $0x20] sm:$0xff]   ;;  %v2013_v27 = vand.u32 7, %v1947_v28  ;;  %vm520_vm6 = vcmp.lt.s32.totalorder %v1947_v28, 1  ;;  %vm710_vm10 = vcmp.lt.s32.totalorder %v1947_v28, 2 }
   0x6   :  { %vm875_vm14 = vcmp.lt.s32.totalorder %v1947_v28, 4 }
   0x7   :  { %1529 = vmatpush3.bf16.msra.mxu0 %v1706_v3  ;;  %v1713_v3 = vld [vmem:[%s2224_s3] sm:$0xff]   ;;  %vm548_vm7 = vcmp.lt.s32.totalorder %v2013_v27, 1  ;;  %vm713_vm11 = vcmp.lt.s32.totalorder %v2013_v27, 2  ;;  %vm878_vm15 = vcmp.lt.s32.totalorder %v2013_v27, 4 }
   0x8   :  { %1530 = vmatprep.subr.bf16.mxu0 %v1805_v0 }
   0xb   :  { %1531 = vmatpush3.bf16.msra.mxu0 %v1707_v4  ;;  %v1714_v4 = vld [vmem:[%s2224_s3 + $0x8] sm:$0xff]  }
   0xc   :  { %1532 = vmatprep.subr.bf16.mxu0 %v1805_v0  ;;  %v53_v13 = vld [vmem:[#allocation2] sm:$0xff] }
   0xf   :  { %1533 = vmatpush3.bf16.msra.mxu0 %v1708_v8  ;;  %v1718_v8 = vld [vmem:[%s2224_s3 + $0x28] sm:$0xff]  }
  0x10   :  { %1534 = vmatprep.subr.bf16.mxu0 %v1805_v0 }
  0x13   :  { %1535 = vmatpush3.bf16.msra.mxu0 %v1709_v9  ;;  %v1719_v9 = vld [vmem:[%s2224_s3 + $0x30] sm:$0xff]  }
  0x14   :  { %1536 = vmatprep.subr.bf16.mxu0 %v1805_v0 }
  0x17   :  { %1537 = vmatpush3.bf16.msra.mxu0 %v1710_v10 }
  0x18   :  { %1538 = vmatprep.subr.bf16.mxu0 %v1805_v0 }
  0x1b   :  { %1539 = vmatpush3.bf16.msra.mxu0 %v1711_v11  ;;  %v1720_v11 = vld [vmem:[%s2224_s3 + $0x38] sm:$0xff]   ;;  %s1811_s3 = smov 96  }
  0x1c   :  { %1540 = vmatprep.subr.bf16.mxu0 %v1805_v0 }
  0x1f   :  { %1541 = vmatpush3.bf16.msra.mxu0 %v1712_v12 }
  0x20   :  { %1570 = vmatprep.subr.bf16.mxu0 %v1805_v0 }
  0x22   :  { %1543 = vmatmul.mubr.bf16.vlgmr.msra.gmra.mrb[0].mxu0 %v53_v13 }
  0x23   :  { %1586 = vmatprep.mubr.msk.bf16.mxu0 %vm1806_vm0, %v1805_v0  ;;  %1571 = vmatpush3.bf16.msra.mxu0 %v1713_v3 }
  0x24   :  { %1572 = vmatprep.subr.bf16.mxu0 %v1805_v0 }
  0x27   :  { %1573 = vmatpush3.bf16.msra.mxu0 %v1714_v4 }
  0x28   :  { %1574 = vmatprep.subr.bf16.mxu0 %v1805_v0 }
  0x2b   :  { %1575 = vmatpush3.bf16.msra.mxu0 %v1715_v5 }
  0x2c   :  { %1576 = vmatprep.subr.bf16.mxu0 %v1805_v0 }
  0x2f   :  { %1577 = vmatpush3.bf16.msra.mxu0 %v1716_v6 }
  0x30   :  { %1578 = vmatprep.subr.bf16.mxu0 %v1805_v0 }
  0x33   :  { %1579 = vmatpush3.bf16.msra.mxu0 %v1717_v7 }
  0x34   :  { %1580 = vmatprep.subr.bf16.mxu0 %v1805_v0 }
  0x37   :  { %1581 = vmatpush3.bf16.msra.mxu0 %v1718_v8 }
  0x38   :  { %1582 = vmatprep.subr.bf16.mxu0 %v1805_v0 }
  0x3b   :  { %1583 = vmatpush3.bf16.msra.mxu0 %v1719_v9 }
  0x3c   :  { %1584 = vmatprep.subr.bf16.mxu0 %v1805_v0 }
  0x3f   :  { %1585 = vmatpush3.bf16.msra.mxu0 %v1720_v11 }
  0x40   :  { %1610 = vmatprep.subr.bf16.mxu0 %v1805_v0 }
  0xf5   :  { %v159_v15 = vpop.f32.mrb[0].mxu0 }
  0xf6   :  { %v160_v16 = vadd.f32 %v1388_v14, %v159_v15  ;;  %v1544_v17 = vpop.f32.mrb[1].mxu0 }
  0xf7   :  { %v162_v18 = vpop.f32.mrb[2].mxu0 }
  0xf8   :  { %v166_v19 = vpack.c.bf16 %v160_v16, %v160_v16  ;;  %v163_v20 = vadd.f32 %v1388_v14, %v162_v18  ;;  %v1545_v21 = vpop.f32.mrb[3].mxu0 }
  0xfa   :  { %169 = vrot.lane.b32.xlu0 %v166_v19, %s1808_s1  ;;  %v167_v22 = vpack.c.bf16 %v163_v20, %v163_v20 }
  0xfe   :  { %219 = vrot.lane.b32.xlu0 %v167_v22, %s1808_s1 }
 0x16c   :  { %v170_v23 = vpop.permute.xlu0 %169 }
 0x16d   :  { %v176_v24 = vsel %vm171_vm2, %v170_v23, 0 }
 0x16e   :  { %1547 = vmatpush3.bf16.xpose.msra.mxu1 %v176_v24 }
 0x16f   :  { %1552 = vmatprep.subr.bf16.mxu1 %v1805_v0 }
 0x170   :  { %v220_v25 = vpop.permute.xlu0 %219 }
 0x171   :  { %v225_v26 = vsel %vm171_vm2, %v220_v25, 0 }
 0x175   :  { %1549 = vmatmul.mubr.msk.bf16.vlgmr.msra.gmra.mrb[0].mxu1 %vm171_vm2, %v166_v19 }
 0x176   :  { %1553 = vmatpush3.bf16.xpose.msra.mxu1 %v225_v26  ;;  %1554 = vmatprep.mubr.msk.bf16.mxu1 %vm1806_vm0, %v1805_v0  ;;  %v523_v26 = vadd.s32 8, %v1947_v28 }
 0x177   :  { %1558 = vmatprep.subr.bf16.mxu1 %v1805_v0 }
 0x17d   :  { %1555 = vmatmul.mubr.msk.bf16.vlgmr.msra.gmra.mrb[4].mxu1 %vm171_vm2, %v167_v22 }
 0x17e   :  { %1560 = vmatprep.mubr.msk.bf16.mxu1 %vm1806_vm0, %v1805_v0 }
 0x248   :  { %v212_v30 = vpop.f32.mrb[0].mxu1 }
 0x249   :  { %v267_v31 = vmul.f32 0.35355338, %v212_v30  ;;  %v1550_v32 = vpop.f32.mrb[1].mxu1  ;;  %v2015_v30 = vand.u32 7, %v523_v26 }
 0x24a   :  { %v215_v33 = vpop.f32.mrb[2].mxu1 }
 0x24b   :  { %v1551_v34 = vpop.f32.mrb[3].mxu1  ;;  %v274_v35 = vsel %vm273_vm3, -1e+30, %v267_v31  ;;  %vm549_vm8 = vcmp.lt.s32.totalorder %v2015_v30, 1  ;;  %vm714_vm12 = vcmp.lt.s32.totalorder %v2015_v30, 2  ;;  %vm879_vm1 = vcmp.lt.s32.totalorder %v2015_v30, 4 }
 0x24c   :  { %v276_v36 = vsel %vm171_vm2, %v274_v35, -inf }
 0x24d   :  { %277 = vmax.xlane.f32.xlu1 %v276_v36 }
 0x250   :  { %v261_v37 = vpop.f32.mrb[4].mxu1 }
 0x251   :  { %v268_v38 = vmul.f32 0.35355338, %v261_v37  ;;  %v1556_v39 = vpop.f32.mrb[5].mxu1  ;;  %v1409_v37 = vld [vmem:[%s2225_s4] ss:$0 sm:$0xff]  ;;  %s1815_s4 = smov 60  }
 0x252   :  { %v264_v40 = vpop.f32.mrb[6].mxu1 }
 0x253   :  { %v1557_v41 = vpop.f32.mrb[7].mxu1  ;;  %v275_v42 = vsel %vm273_vm3, -1e+30, %v268_v38 }
 0x254   :  { %v279_v43 = vsel %vm171_vm2, %v275_v42, -inf }
 0x255   :  { %280 = vmax.xlane.f32.xlu1 %v279_v43 }
 0x266   :  { %300 = vrot.lane.b32.xlu1 %v166_v19, %s1809_s2 }
 0x2da   :  { %v278_v44 = vpop.xlane.xlu1 %277 }
 0x2db   :  { %v282_v45 = vsub.f32 %v274_v35, %v278_v44 }
 0x2dd   :  { %v284_v46 = vmul.f32 1.442695, %v282_v45 }
 0x2df   :  { %1753 = vpow2.f32 %v284_v46 }
 0x2e2   :  { %v281_v47 = vpop.xlane.xlu1 %280 }
 0x2e3   :  { %v283_v48 = vsub.f32 %v275_v42, %v281_v47 }
 0x2e5   :  { %v286_v49 = vmul.f32 1.442695, %v283_v48 }
 0x2e6   :  { %v301_v50 = vpop.permute.xlu1 %300 }
 0x2e7   :  { %1755 = vpow2.f32 %v286_v49  ;;  %v307_v51 = vsel %vm305_vm4, %v301_v50, 0  ;;  %v1721_v50 = vld [vmem:[%s2226_s5] sm:$0xff]  }
 0x2e8   :  { %1559 = vmatpush3.bf16.msra.mxu1 %v307_v51  ;;  %v1722_v51 = vld [vmem:[%s2226_s5 + $0x8] sm:$0xff]  }
 0x2e9   :  { %v1754_v52 = vpop.eup %1753  ;;  %1564 = vmatprep.subr.bf16.mxu1 %v1805_v0 }
 0x2ea   :  { %v288_v53 = vsel %vm171_vm2, %v1754_v52, 0.0 }
 0x2eb   :  { %289 = vadd.xlane.f32.xlu0 %v288_v53  ;;  %v1723_v53 = vld [vmem:[%s2226_s5 + $0x10] sm:$0xff]  }
 0x2f1   :  { %v1756_v54 = vpop.eup %1755 }
 0x2f2   :  { %v291_v55 = vsel %vm171_vm2, %v1756_v54, 0.0 }
 0x2f3   :  { %292 = vadd.xlane.f32.xlu1 %v291_v55  ;;  %v1724_v55 = vld [vmem:[%s2226_s5 + $0x18] sm:$0xff]  }
 0x304   :  { %349 = vrot.lane.b32.xlu1 %v167_v22, %s1809_s2 }
 0x378   :  { %v290_v56 = vpop.xlane.xlu0 %289 }
 0x379   :  { %1757 = vrcp.f32 %v290_v56  ;;  %v1725_v56 = vld [vmem:[%s2226_s5 + $0x20] sm:$0xff]  }
 0x380   :  { %v293_v57 = vpop.xlane.xlu1 %292 }
 0x381   :  { %1759 = vrcp.f32 %v293_v57  ;;  %v1726_v57 = vld [vmem:[%s2226_s5 + $0x28] sm:$0xff]  }
 0x383   :  { %v1758_v58 = vpop.eup %1757 }
 0x384   :  { %v296_v59 = vmul.f32 %v1758_v58, %v1754_v52  ;;  %v350_v60 = vpop.permute.xlu1 %349  ;;  %v1727_v58 = vld [vmem:[%s2226_s5 + $0x30] sm:$0xff]  }
 0x385   :  { %v355_v62 = vsel %vm305_vm4, %v350_v60, 0 }
 0x386   :  { %v298_v61 = vpack.c.bf16 %v296_v59, %v296_v59  ;;  %v1728_v59 = vld [vmem:[%s2226_s5 + $0x38] sm:$0xff]  }
 0x388   :  { %1561 = vmatmul.mubr.msk.bf16.vlgmr.msra.gmra.mrb[8].mxu1 %vm171_vm2, %v298_v61 }
 0x389   :  { %1565 = vmatpush3.bf16.msra.mxu1 %v355_v62  ;;  %1566 = vmatprep.mubr.msk.bf16.mxu1 %vm1806_vm0, %v1805_v0 }
 0x38a   :  { %1590 = vmatprep.subr.bf16.mxu1 %v1805_v0 }
 0x38b   :  { %v1760_v63 = vpop.eup %1759 }
 0x38c   :  { %v297_v1 = vmul.f32 %v1760_v63, %v1756_v54 }
 0x38e   :  { %v299_v2 = vpack.c.bf16 %v297_v1, %v297_v1 }
 0x390   :  { %1567 = vmatmul.mubr.msk.bf16.vlgmr.msra.gmra.mrb[12].mxu1 %vm171_vm2, %v299_v2 }
 0x391   :  { %1606 = vmatprep.mubr.msk.bf16.mxu1 %vm1806_vm0, %v1805_v0  ;;  %1591 = vmatpush3.bf16.msra.mxu1 %v1721_v50 }
 0x392   :  { %1592 = vmatprep.subr.bf16.mxu1 %v1805_v0 }
 0x395   :  { %1593 = vmatpush3.bf16.msra.mxu1 %v1722_v51 }
 0x396   :  { %1594 = vmatprep.subr.bf16.mxu1 %v1805_v0 }
 0x399   :  { %1595 = vmatpush3.bf16.msra.mxu1 %v1723_v53 }
 0x39a   :  { %1596 = vmatprep.subr.bf16.mxu1 %v1805_v0 }
 0x39d   :  { %1597 = vmatpush3.bf16.msra.mxu1 %v1724_v55 }
 0x39e   :  { %1598 = vmatprep.subr.bf16.mxu1 %v1805_v0 }
 0x3a1   :  { %1599 = vmatpush3.bf16.msra.mxu1 %v1725_v56 }
 0x3a2   :  { %1600 = vmatprep.subr.bf16.mxu1 %v1805_v0 }
 0x3a5   :  { %1601 = vmatpush3.bf16.msra.mxu1 %v1726_v57 }
 0x3a6   :  { %1602 = vmatprep.subr.bf16.mxu1 %v1805_v0 }
 0x3a9   :  { %1603 = vmatpush3.bf16.msra.mxu1 %v1727_v58 }
 0x3aa   :  { %1604 = vmatprep.subr.bf16.mxu1 %v1805_v0 }
 0x3ad   :  { %1605 = vmatpush3.bf16.msra.mxu1 %v1728_v59 }
 0x3ae   :  { %1630 = vmatprep.subr.bf16.mxu1 %v1805_v0 }
 0x45b   :  { %v343_v10 = vpop.f32.mrb[8].mxu1 }
 0x45c   :  { %v1562_v12 = vpop.f32.mrb[9].mxu1 }
 0x45d   :  { %v346_v13 = vpop.f32.mrb[10].mxu1 }
 0x45e   :  { %v1563_v14 = vpop.f32.mrb[11].mxu1 }
 0x463   :  { %v391_v15 = vpop.f32.mrb[12].mxu1 }
 0x464   :  { %v397_v16 = vpack.c.bf16 %v391_v15, %v343_v10  ;;  %v1568_v17 = vpop.f32.mrb[13].mxu1 }
 0x465   :  { %v394_v18 = vpop.f32.mrb[14].mxu1 }
 0x466   :  { %399 = vrot.lane.b32.xlu1 %v397_v16, %s1810_s27  ;;  %v1569_v19 = vpop.f32.mrb[15].mxu1  ;;  %s1812_s27 = smov 12   ;;  %v1420_v16 = vld [vmem:[%s2227_s6] ss:$0 sm:$0xff] }
 0x4d8   :  { %v400_v20 = vpop.permute.xlu1 %399 }
 0x4d9   :  { %403 = vst.msk [vmem:[#allocation2] sm:$0xff] %vm402_vm5, %v400_v20  ;;  %vm922_vm5 = vcmask 490848  }
 0x4e0   :  { %v404_v21 = vld [vmem:[#allocation2] sm:$0xff] }
 0x4e1   :  { %1587 = vmatmul.mubr.bf16.vlgmr.msra.gmra.mrb[4].mxu0 %v404_v21 }
 0x4e2   :  { %1626 = vmatprep.mubr.msk.bf16.mxu0 %vm1806_vm0, %v1805_v0 }
 0x5b4   :  { %v503_v22 = vpop.f32.mrb[4].mxu0 }
 0x5b5   :  { %512 = vrot.lane.b32.xlu1 %v503_v22, %s1811_s3  ;;  %v1588_v23 = vpop.f32.mrb[5].mxu0 }
 0x5b6   :  { %v506_v24 = vpop.f32.mrb[6].mxu0 }
 0x5b7   :  { %514 = vrot.lane.b32.xlu0 %v506_v24, %s1811_s3  ;;  %v1589_v25 = vpop.f32.mrb[7].mxu0 }
 0x627   :  { %v513_v31 = vpop.permute.xlu1 %512 }
 0x628   :  { %v518_v33 = vrot.slane %v513_v31, 7 }
 0x629   :  { %v515_v32 = vpop.permute.xlu0 %514 }
 0x62a   :  { %v519_v34 = vrot.slane %v515_v32, 7 }
 0x62c   :  { %v521_v35 = vsel %vm520_vm6, %v518_v33, %v519_v34  ;;  %v522_v36 = vsel %vm520_vm6, %v519_v34, %v518_v33  ;;  %v1729_v33 = vld [vmem:[%s2228_s7] sm:$0xff]   ;;  %v1730_v34 = vld [vmem:[%s2228_s7 + $0x8] sm:$0xff]  }
 0x62d   :  { %v550_v38 = vsel %vm548_vm7, 0.0, %v522_v36  ;;  %v551_v39 = vsel %vm549_vm8, 0.0, %v521_v35  ;;  %1611 = vmatpush3.bf16.msra.mxu0 %v1729_v33  ;;  %v1731_v35 = vld [vmem:[%s2228_s7 + $0x10] sm:$0xff]   ;;  %v1434_v33 = vld [vmem:[%s2231_s10] ss:$0 sm:$0xff] }
 0x62e   :  { %v552_v40 = vadd.f32 %v550_v38, %v503_v22  ;;  %v553_v41 = vadd.f32 %v551_v39, %v506_v24  ;;  %1612 = vmatprep.subr.bf16.mxu0 %v1805_v0  ;;  %v1732_v38 = vld [vmem:[%s2228_s7 + $0x18] sm:$0xff]   ;;  %v1733_v39 = vld [vmem:[%s2228_s7 + $0x20] sm:$0xff]  }
 0x630   :  { %v561_v42 = vadd.f32 %v1409_v37, %v552_v40  ;;  %v562_v43 = vadd.f32 %v1409_v37, %v553_v41  ;;  %v1734_v40 = vld [vmem:[%s2228_s7 + $0x28] sm:$0xff]   ;;  %v1735_v41 = vld [vmem:[%s2228_s7 + $0x30] sm:$0xff]  }
 0x631   :  { %1613 = vmatpush3.bf16.msra.mxu0 %v1730_v34 }
 0x632   :  { %v1410_v44 = vmul.f32 -1.442695, %v561_v42  ;;  %v1411_v45 = vmul.f32 -1.442695, %v562_v43  ;;  %1614 = vmatprep.subr.bf16.mxu0 %v1805_v0 }
 0x634   :  { %1761 = vpow2.f32 %v1410_v44 }
 0x635   :  { %1763 = vpow2.f32 %v1411_v45  ;;  %1615 = vmatpush3.bf16.msra.mxu0 %v1731_v35 }
 0x636   :  { %1616 = vmatprep.subr.bf16.mxu0 %v1805_v0 }
 0x639   :  { %1617 = vmatpush3.bf16.msra.mxu0 %v1732_v38 }
 0x63a   :  { %1618 = vmatprep.subr.bf16.mxu0 %v1805_v0 }
 0x63d   :  { %1619 = vmatpush3.bf16.msra.mxu0 %v1733_v39 }
 0x63e   :  { %v1762_v46 = vpop.eup %1761  ;;  %1620 = vmatprep.subr.bf16.mxu0 %v1805_v0 }
 0x63f   :  { %v1764_v47 = vpop.eup %1763  ;;  %v571_v48 = vadd.f32 1.0, %v1762_v46 }
 0x640   :  { %v572_v49 = vadd.f32 1.0, %v1764_v47 }
 0x641   :  { %1765 = vrcp.f32 %v571_v48  ;;  %1621 = vmatpush3.bf16.msra.mxu0 %v1734_v40 }
 0x642   :  { %1767 = vrcp.f32 %v572_v49  ;;  %1622 = vmatprep.subr.bf16.mxu0 %v1805_v0 }
 0x643   :  { %1769 = vtanh.f32 %v561_v42  ;;  %v1736_v42 = vld [vmem:[%s2228_s7 + $0x38] sm:$0xff]  }
 0x644   :  { %1771 = vtanh.f32 %v562_v43 }
 0x645   :  { %1623 = vmatpush3.bf16.msra.mxu0 %v1735_v41 }
 0x646   :  { %1624 = vmatprep.subr.bf16.mxu0 %v1805_v0 }
 0x649   :  { %1625 = vmatpush3.bf16.msra.mxu0 %v1736_v42 }
 0x64a   :  { %1674 = vmatprep.subr.bf16.mxu0 %v1805_v0 }
 0x64b   :  { %v1766_v52 = vpop.eup %1765 }
 0x64c   :  { %579 = vrot.lane.b32.xlu1 %v1766_v52, %s1809_s2  ;;  %v1768_v54 = vpop.eup %1767 }
 0x64d   :  { %v1770_v61 = vpop.eup %1769 }
 0x64e   :  { %v1772_v62 = vpop.eup %1771 }
 0x650   :  { %581 = vrot.lane.b32.xlu1 %v1768_v54, %s1809_s2 }
 0x6be   :  { %v580_v60 = vpop.permute.xlu1 %579 }
 0x6bf   :  { %v585_v1 = vmul.f32 %v1770_v61, %v580_v60 }
 0x6c2   :  { %v582_v63 = vpop.permute.xlu1 %581 }
 0x6c3   :  { %v586_v2 = vmul.f32 %v1772_v62, %v582_v63  ;;  %v1431_v62 = vld [vmem:[%s2229_s8] ss:$0 sm:$0xff] }
 0x6c5   :  { %v587_v3 = vpack.c.bf16 %v586_v2, %v585_v1 }
 0x6c7   :  { %589 = vrot.lane.b32.xlu1 %v587_v3, %s1812_s27 }
 0x739   :  { %v590_v4 = vpop.permute.xlu1 %589 }
 0x73a   :  { %593 = vst.msk [vmem:[#allocation2] sm:$0xff] %vm592_vm9, %v590_v4 }
 0x741   :  { %v594_v5 = vld [vmem:[#allocation2] sm:$0xff] }
 0x742   :  { %1607 = vmatmul.mubr.bf16.vlgmr.msra.gmra.mrb[16].mxu1 %v594_v5 }
 0x743   :  { %1646 = vmatprep.mubr.msk.bf16.mxu1 %vm1806_vm0, %v1805_v0 }
 0x815   :  { %v693_v6 = vpop.f32.mrb[16].mxu1 }
 0x816   :  { %702 = vrot.lane.b32.xlu1 %v693_v6, %s1811_s3  ;;  %v1608_v7 = vpop.f32.mrb[17].mxu1 }
 0x817   :  { %v696_v8 = vpop.f32.mrb[18].mxu1 }
 0x818   :  { %v1609_v9 = vpop.f32.mrb[19].mxu1 }
 0x81a   :  { %704 = vrot.lane.b32.xlu1 %v696_v8, %s1811_s3 }
 0x888   :  { %v703_v10 = vpop.permute.xlu1 %702 }
 0x889   :  { %v708_v12 = vrot.slane %v703_v10, 6  ;;  %v1737_v10 = vld [vmem:[%s2230_s9] sm:$0xff]  }
 0x88a   :  { %1631 = vmatpush3.bf16.msra.mxu1 %v1737_v10 }
 0x88b   :  { %1632 = vmatprep.subr.bf16.mxu1 %v1805_v0 }
 0x88c   :  { %v705_v11 = vpop.permute.xlu1 %704 }
 0x88d   :  { %v709_v13 = vrot.slane %v705_v11, 6  ;;  %v1738_v11 = vld [vmem:[%s2230_s9 + $0x8] sm:$0xff]  }
 0x88e   :  { %1633 = vmatpush3.bf16.msra.mxu1 %v1738_v11 }
 0x88f   :  { %v711_v14 = vsel %vm710_vm10, %v708_v12, %v709_v13  ;;  %v712_v15 = vsel %vm710_vm10, %v709_v13, %v708_v12  ;;  %v1739_v12 = vld [vmem:[%s2230_s9 + $0x10] sm:$0xff]   ;;  %1634 = vmatprep.subr.bf16.mxu1 %v1805_v0 }
 0x890   :  { %v715_v17 = vsel %vm713_vm11, 0.0, %v712_v15  ;;  %v716_v18 = vsel %vm714_vm12, 0.0, %v711_v14  ;;  %v1740_v15 = vld [vmem:[%s2230_s9 + $0x18] sm:$0xff]  }
 0x891   :  { %v717_v19 = vadd.f32 %v715_v17, %v693_v6  ;;  %v718_v20 = vadd.f32 %v716_v18, %v696_v8  ;;  %v1742_v17 = vld [vmem:[%s2230_s9 + $0x28] sm:$0xff]   ;;  %v1743_v18 = vld [vmem:[%s2230_s9 + $0x30] sm:$0xff]  }
 0x892   :  { %1635 = vmatpush3.bf16.msra.mxu1 %v1739_v12 }
 0x893   :  { %v726_v21 = vadd.f32 %v1420_v16, %v717_v19  ;;  %v727_v22 = vadd.f32 %v1420_v16, %v718_v20  ;;  %1636 = vmatprep.subr.bf16.mxu1 %v1805_v0  ;;  %v1741_v16 = vld [vmem:[%s2230_s9 + $0x20] sm:$0xff]   ;;  %v1744_v19 = vld [vmem:[%s2230_s9 + $0x38] sm:$0xff]  }
 0x895   :  { %v1421_v23 = vmul.f32 -1.442695, %v726_v21  ;;  %v1422_v24 = vmul.f32 -1.442695, %v727_v22 }
 0x896   :  { %1637 = vmatpush3.bf16.msra.mxu1 %v1740_v15  ;;  %v1745_v15 = vld [vmem:[%s2232_s11] sm:$0xff]  }
 0x897   :  { %1773 = vpow2.f32 %v1421_v23  ;;  %1638 = vmatprep.subr.bf16.mxu1 %v1805_v0 }
 0x898   :  { %1775 = vpow2.f32 %v1422_v24 }
 0x89a   :  { %1639 = vmatpush3.bf16.msra.mxu1 %v1741_v16  ;;  %v1746_v16 = vld [vmem:[%s2232_s11 + $0x8] sm:$0xff]  }
 0x89b   :  { %1640 = vmatprep.subr.bf16.mxu1 %v1805_v0 }
 0x89e   :  { %1641 = vmatpush3.bf16.msra.mxu1 %v1742_v17  ;;  %v1747_v17 = vld [vmem:[%s2232_s11 + $0x10] sm:$0xff]  }
 0x89f   :  { %1642 = vmatprep.subr.bf16.mxu1 %v1805_v0 }
 0x8a1   :  { %v1774_v25 = vpop.eup %1773 }
 0x8a2   :  { %v1776_v26 = vpop.eup %1775  ;;  %v736_v31 = vadd.f32 1.0, %v1774_v25  ;;  %1643 = vmatpush3.bf16.msra.mxu1 %v1743_v18  ;;  %v1748_v18 = vld [vmem:[%s2232_s11 + $0x18] sm:$0xff]  }
 0x8a3   :  { %v737_v32 = vadd.f32 1.0, %v1776_v26  ;;  %1644 = vmatprep.subr.bf16.mxu1 %v1805_v0 }
 0x8a4   :  { %1777 = vrcp.f32 %v736_v31 }
 0x8a5   :  { %1779 = vrcp.f32 %v737_v32 }
 0x8a6   :  { %1781 = vtanh.f32 %v726_v21  ;;  %1645 = vmatpush3.bf16.msra.mxu1 %v1744_v19  ;;  %v1749_v19 = vld [vmem:[%s2232_s11 + $0x20] sm:$0xff]  }
 0x8a7   :  { %1783 = vtanh.f32 %v727_v22  ;;  %1650 = vmatprep.subr.bf16.mxu1 %v1805_v0 }
 0x8ae   :  { %v1778_v36 = vpop.eup %1777 }
 0x8af   :  { %v1780_v37 = vpop.eup %1779  ;;  %744 = vrot.lane.b32.xlu0 %v1778_v36, %s1809_s2 }
 0x8b0   :  { %746 = vrot.lane.b32.xlu1 %v1780_v37, %s1809_s2  ;;  %v1782_v43 = vpop.eup %1781 }
 0x8b1   :  { %v1784_v45 = vpop.eup %1783 }
 0x921   :  { %v745_v44 = vpop.permute.xlu0 %744 }
 0x922   :  { %v750_v46 = vmul.f32 %v1782_v43, %v745_v44  ;;  %v747_v47 = vpop.permute.xlu1 %746 }
 0x923   :  { %v751_v48 = vmul.f32 %v1784_v45, %v747_v47 }
 0x925   :  { %v752_v49 = vpack.c.bf16 %v751_v48, %v750_v46 }
 0x927   :  { %754 = vrot.lane.b32.xlu0 %v752_v49, %s1813_s25 }
 0x999   :  { %v755_v50 = vpop.permute.xlu0 %754 }
 0x99a   :  { %758 = vst.msk [vmem:[#allocation2] sm:$0xff] %vm757_vm13, %v755_v50 }
 0x9a1   :  { %v759_v51 = vld [vmem:[#allocation2] sm:$0xff] }
 0x9a2   :  { %1627 = vmatmul.mubr.bf16.vlgmr.msra.gmra.mrb[8].mxu0 %v759_v51 }
 0x9a3   :  { %1690 = vmatprep.mubr.msk.bf16.mxu0 %vm1806_vm0, %v1805_v0  ;;  %1675 = vmatpush3.bf16.msra.mxu0 %v1745_v15 }
 0x9a4   :  { %1676 = vmatprep.subr.bf16.mxu0 %v1805_v0 }
 0x9a7   :  { %1677 = vmatpush3.bf16.msra.mxu0 %v1746_v16 }
 0x9a8   :  { %1678 = vmatprep.subr.bf16.mxu0 %v1805_v0 }
 0x9ab   :  { %1679 = vmatpush3.bf16.msra.mxu0 %v1747_v17 }
 0x9ac   :  { %1680 = vmatprep.subr.bf16.mxu0 %v1805_v0 }
 0x9af   :  { %1681 = vmatpush3.bf16.msra.mxu0 %v1748_v18 }
 0x9b0   :  { %1682 = vmatprep.subr.bf16.mxu0 %v1805_v0 }
 0x9b3   :  { %1683 = vmatpush3.bf16.msra.mxu0 %v1749_v19 }
 0x9b4   :  { %1684 = vmatprep.subr.bf16.mxu0 %v1805_v0 }
 0xa75   :  { %v858_v52 = vpop.f32.mrb[8].mxu0 }
 0xa76   :  { %867 = vrot.lane.b32.xlu1 %v858_v52, %s1811_s3  ;;  %v1628_v53 = vpop.f32.mrb[9].mxu0 }
 0xa77   :  { %v861_v54 = vpop.f32.mrb[10].mxu0 }
 0xa78   :  { %869 = vrot.lane.b32.xlu0 %v861_v54, %s1811_s3  ;;  %v1629_v55 = vpop.f32.mrb[11].mxu0 }
 0xae8   :  { %v868_v56 = vpop.permute.xlu1 %867 }
 0xae9   :  { %v873_v58 = vrot.slane %v868_v56, 4 }
 0xaea   :  { %v870_v57 = vpop.permute.xlu0 %869 }
 0xaeb   :  { %v874_v59 = vrot.slane %v870_v57, 4 }
 0xaed   :  { %v876_v60 = vsel %vm875_vm14, %v873_v58, %v874_v59  ;;  %v877_v61 = vsel %vm875_vm14, %v874_v59, %v873_v58 }
 0xaee   :  { %v880_v63 = vsel %vm878_vm15, 0.0, %v877_v61  ;;  %v881_v1 = vsel %vm879_vm1, 0.0, %v876_v60 }
 0xaef   :  { %v882_v2 = vadd.f32 %v880_v63, %v858_v52  ;;  %v883_v3 = vadd.f32 %v881_v1, %v861_v54 }
 0xaf1   :  { %v891_v4 = vadd.f32 %v1431_v62, %v882_v2  ;;  %v892_v5 = vadd.f32 %v1431_v62, %v883_v3 }
 0xaf3   :  { %v1432_v6 = vmul.f32 -1.442695, %v891_v4  ;;  %v1433_v7 = vmul.f32 -1.442695, %v892_v5 }
 0xaf5   :  { %1785 = vpow2.f32 %v1432_v6 }
 0xaf6   :  { %1787 = vpow2.f32 %v1433_v7 }
 0xaff   :  { %v1786_v27 = vpop.eup %1785 }
 0xb00   :  { %v1788_v8 = vpop.eup %1787  ;;  %v901_v30 = vadd.f32 1.0, %v1786_v27 }
 0xb01   :  { %v902_v9 = vadd.f32 1.0, %v1788_v8 }
 0xb02   :  { %1789 = vrcp.f32 %v901_v30 }
 0xb03   :  { %1791 = vrcp.f32 %v902_v9 }
 0xb04   :  { %1793 = vtanh.f32 %v891_v4 }
 0xb05   :  { %1795 = vtanh.f32 %v892_v5 }
 0xb0c   :  { %v1790_v13 = vpop.eup %1789 }
 0xb0d   :  { %v1792_v14 = vpop.eup %1791  ;;  %909 = vrot.lane.b32.xlu1 %v1790_v13, %s1809_s2 }
 0xb0e   :  { %911 = vrot.lane.b32.xlu0 %v1792_v14, %s1809_s2  ;;  %v1794_v20 = vpop.eup %1793 }
 0xb0f   :  { %v1796_v22 = vpop.eup %1795 }
 0xb7f   :  { %v910_v21 = vpop.permute.xlu1 %909 }
 0xb80   :  { %v915_v23 = vmul.f32 %v1794_v20, %v910_v21  ;;  %v912_v24 = vpop.permute.xlu0 %911  ;;  %v1750_v20 = vld [vmem:[%s2232_s11 + $0x28] sm:$0xff]   ;;  %v1751_v21 = vld [vmem:[%s2232_s11 + $0x30] sm:$0xff]  }
 0xb81   :  { %v916_v25 = vmul.f32 %v1796_v22, %v912_v24  ;;  %1685 = vmatpush3.bf16.msra.mxu0 %v1750_v20 }
 0xb82   :  { %1686 = vmatprep.subr.bf16.mxu0 %v1805_v0 }
 0xb83   :  { %v917_v26 = vpack.c.bf16 %v916_v25, %v915_v23  ;;  %v1752_v23 = vld [vmem:[%s2232_s11 + $0x38] sm:$0xff]  }
 0xb85   :  { %919 = vrot.lane.b32.xlu1 %v917_v26, %s1814_s21  ;;  %1687 = vmatpush3.bf16.msra.mxu0 %v1751_v21 }
 0xb86   :  { %1688 = vmatprep.subr.bf16.mxu0 %v1805_v0 }
 0xb89   :  { %1689 = vmatpush3.bf16.msra.mxu0 %v1752_v23 }
 0xbf7   :  { %v920_v31 = vpop.permute.xlu1 %919 }
 0xbf8   :  { %923 = vst.msk [vmem:[#allocation2] sm:$0xff] %vm922_vm5, %v920_v31  ;;  %v18_v31 = vstv %s2233_s12 }
 0xbf9   :  { %19 = vst [vmem:[#allocation3] sm:$0x1] %v18_v31 }
 0xbff   :  { %v924_v32 = vld [vmem:[#allocation2] sm:$0xff] }
 0xc00   :  { %1647 = vmatmul.mubr.bf16.vlgmr.msra.gmra.mrb[20].mxu1 %v924_v32 }
 0xc01   :  { %1652 = vmatprep.mubr.msk.bf16.mxu1 %vm1806_vm0, %v1805_v0 }
 0xcd3   :  { %v1030_v34 = vpop.f32.mrb[20].mxu1 }
 0xcd4   :  { %v1031_v35 = vadd.f32 %v1434_v33, %v1030_v34  ;;  %v1648_v36 = vpop.f32.mrb[21].mxu1 }
 0xcd5   :  { %v1033_v37 = vpop.f32.mrb[22].mxu1 }
 0xcd6   :  { %v1037_v38 = vpack.c.bf16 %v1031_v35, %v1031_v35  ;;  %v1034_v39 = vadd.f32 %v1434_v33, %v1033_v37  ;;  %v1649_v40 = vpop.f32.mrb[23].mxu1 }
 0xcd8   :  { %v1038_v41 = vpack.c.bf16 %v1034_v39, %v1034_v39  ;;  %1040 = vrot.lane.b32.xlu0 %v1037_v38, %s1808_s1 }
 0xcda   :  { %1089 = vrot.lane.b32.xlu1 %v1038_v41, %s1808_s1 }
 0xd4a   :  { %v1041_v42 = vpop.permute.xlu0 %1040 }
 0xd4b   :  { %v1046_v43 = vsel %vm171_vm2, %v1041_v42, 0 }
 0xd4c   :  { %1651 = vmatpush3.bf16.xpose.msra.mxu1 %v1046_v43  ;;  %v1090_v44 = vpop.permute.xlu1 %1089 }
 0xd4d   :  { %1656 = vmatprep.subr.bf16.mxu1 %v1805_v0  ;;  %v1095_v45 = vsel %vm171_vm2, %v1090_v44, 0 }
 0xd53   :  { %1653 = vmatmul.mubr.msk.bf16.vlgmr.msra.gmra.mrb[24].mxu1 %vm171_vm2, %v1037_v38 }
 0xd54   :  { %1657 = vmatpush3.bf16.xpose.msra.mxu1 %v1095_v45  ;;  %1658 = vmatprep.mubr.msk.bf16.mxu1 %vm1806_vm0, %v1805_v0 }
 0xd55   :  { %1662 = vmatprep.subr.bf16.mxu1 %v1805_v0 }
 0xd5b   :  { %1659 = vmatmul.mubr.msk.bf16.vlgmr.msra.gmra.mrb[28].mxu1 %vm171_vm2, %v1038_v41 }
 0xd5c   :  { %1664 = vmatprep.mubr.msk.bf16.mxu1 %vm1806_vm0, %v1805_v0 }
 0xe26   :  { %v1082_v46 = vpop.f32.mrb[24].mxu1 }
 0xe27   :  { %v1137_v47 = vmul.f32 0.35355338, %v1082_v46  ;;  %v1654_v48 = vpop.f32.mrb[25].mxu1 }
 0xe28   :  { %v1085_v49 = vpop.f32.mrb[26].mxu1 }
 0xe29   :  { %v1655_v50 = vpop.f32.mrb[27].mxu1  ;;  %v1139_v51 = vsel %vm273_vm3, -1e+30, %v1137_v47 }
 0xe2a   :  { %v1141_v52 = vsel %vm171_vm2, %v1139_v51, -inf }
 0xe2b   :  { %1142 = vmax.xlane.f32.xlu0 %v1141_v52 }
 0xe2e   :  { %v1131_v53 = vpop.f32.mrb[28].mxu1 }
 0xe2f   :  { %v1138_v54 = vmul.f32 0.35355338, %v1131_v53  ;;  %v1660_v55 = vpop.f32.mrb[29].mxu1 }
 0xe30   :  { %v1134_v56 = vpop.f32.mrb[30].mxu1 }
 0xe31   :  { %v1661_v57 = vpop.f32.mrb[31].mxu1  ;;  %v1140_v58 = vsel %vm273_vm3, -1e+30, %v1138_v54 }
 0xe32   :  { %v1144_v59 = vsel %vm171_vm2, %v1140_v58, -inf }
 0xe33   :  { %1145 = vmax.xlane.f32.xlu1 %v1144_v59 }
 0xe44   :  { %1165 = vrot.lane.b32.xlu1 %v1037_v38, %s1809_s2 }
 0xeb8   :  { %v1143_v60 = vpop.xlane.xlu0 %1142 }
 0xeb9   :  { %v1147_v61 = vsub.f32 %v1139_v51, %v1143_v60 }
 0xebb   :  { %v1149_v62 = vmul.f32 1.442695, %v1147_v61 }
 0xebd   :  { %1797 = vpow2.f32 %v1149_v62 }
 0xec0   :  { %v1146_v63 = vpop.xlane.xlu1 %1145 }
 0xec1   :  { %v1148_v1 = vsub.f32 %v1140_v58, %v1146_v63 }
 0xec3   :  { %v1151_v2 = vmul.f32 1.442695, %v1148_v1 }
 0xec4   :  { %v1166_v3 = vpop.permute.xlu1 %1165 }
 0xec5   :  { %1799 = vpow2.f32 %v1151_v2  ;;  %v1171_v4 = vsel %vm305_vm4, %v1166_v3, 0 }
 0xec6   :  { %1663 = vmatpush3.bf16.msra.mxu1 %v1171_v4 }
 0xec7   :  { %v1798_v5 = vpop.eup %1797  ;;  %1668 = vmatprep.subr.bf16.mxu1 %v1805_v0 }
 0xec8   :  { %v1153_v28 = vsel %vm171_vm2, %v1798_v5, 0.0 }
 0xec9   :  { %1154 = vadd.xlane.f32.xlu0 %v1153_v28 }
 0xecf   :  { %v1800_v29 = vpop.eup %1799 }
 0xed0   :  { %v1156_v6 = vsel %vm171_vm2, %v1800_v29, 0.0 }
 0xed1   :  { %1157 = vadd.xlane.f32.xlu0 %v1156_v6 }
 0xee7   :  { %1213 = vrot.lane.b32.xlu0 %v1038_v41, %s1809_s2 }
 0xf56   :  { %v1155_v7 = vpop.xlane.xlu0 %1154 }
 0xf57   :  { %1801 = vrcp.f32 %v1155_v7 }
 0xf5e   :  { %v1158_v27 = vpop.xlane.xlu0 %1157 }
 0xf5f   :  { %1803 = vrcp.f32 %v1158_v27 }
 0xf61   :  { %v1802_v8 = vpop.eup %1801 }
 0xf62   :  { %v1161_v30 = vmul.f32 %v1802_v8, %v1798_v5  ;;  %v1214_v9 = vpop.permute.xlu0 %1213 }
 0xf63   :  { %v1219_v11 = vsel %vm305_vm4, %v1214_v9, 0 }
 0xf64   :  { %v1163_v10 = vpack.c.bf16 %v1161_v30, %v1161_v30 }
 0xf66   :  { %1665 = vmatmul.mubr.msk.bf16.vlgmr.msra.gmra.mrb[32].mxu1 %vm171_vm2, %v1163_v10 }
 0xf67   :  { %1669 = vmatpush3.bf16.msra.mxu1 %v1219_v11  ;;  %1670 = vmatprep.mubr.msk.bf16.mxu1 %vm1806_vm0, %v1805_v0  ;;  %vm1266_vm0 = vcmask 556512   ;;  %v1447_v0 = vld [vmem:[#allocation3] ss:$0 sm:$0xff] }
 0xf69   :  { %v1804_v12 = vpop.eup %1803 }
 0xf6a   :  { %v1162_v13 = vmul.f32 %v1804_v12, %v1800_v29 }
 0xf6c   :  { %v1164_v14 = vpack.c.bf16 %v1162_v13, %v1162_v13 }
 0xf6e   :  { %1671 = vmatmul.mubr.msk.bf16.vlgmr.msra.gmra.mrb[36].mxu1 %vm171_vm2, %v1164_v14  ;;  %vm1381_vm2 = vcmask 7168  }
0x1039   :  { %v1207_v22 = vpop.f32.mrb[32].mxu1 }
0x103a   :  { %v1666_v24 = vpop.f32.mrb[33].mxu1 }
0x103b   :  { %v1210_v25 = vpop.f32.mrb[34].mxu1 }
0x103c   :  { %v1667_v26 = vpop.f32.mrb[35].mxu1 }
0x1041   :  { %v1255_v32 = vpop.f32.mrb[36].mxu1 }
0x1042   :  { %v1261_v33 = vpack.c.bf16 %v1255_v32, %v1207_v22  ;;  %v1672_v34 = vpop.f32.mrb[37].mxu1 }
0x1043   :  { %v1258_v35 = vpop.f32.mrb[38].mxu1 }
0x1044   :  { %1263 = vrot.lane.b32.xlu1 %v1261_v33, %s1815_s4  ;;  %v1673_v36 = vpop.f32.mrb[39].mxu1 }
0x10b6   :  { %v1264_v37 = vpop.permute.xlu1 %1263 }
0x10b7   :  { %1267 = vst.msk [vmem:[#allocation2] sm:$0xff] %vm1266_vm0, %v1264_v37 }
0x10be   :  { %v1268_v38 = vld [vmem:[#allocation2] sm:$0xff] }
0x10bf   :  { %1691 = vmatmul.mubr.bf16.vlgmr.msra.gmra.mrb[12].mxu0 %v1268_v38 }
0x1192   :  { %v1374_v39 = vpop.f32.mrb[12].mxu0 }
0x1193   :  { %v1375_v40 = vadd.f32 %v1447_v0, %v1374_v39  ;;  %v1692_v41 = vpop.f32.mrb[13].mxu0 }
0x1194   :  { %v1377_v42 = vpop.f32.mrb[14].mxu0 }
0x1195   :  { %1382 = vst.msk [vmem:[%s2234_s13] sm:$0xff] %vm1381_vm2, %v1375_v40  ;;  %v1378_v43 = vadd.f32 %v1447_v0, %v1377_v42  ;;  %v1693_v44 = vpop.f32.mrb[15].mxu0 }
0x1197   :  { %1383 = vst.msk [vmem:[%s2234_s13 + $0x8] sm:$0xff] %vm1381_vm2, %v1378_v43 }

</bundles_post_ra>
